<compile_context>
chip_gen: v7x
topology: tpu7x:2x2x1
jax: 0.10.0
libtpu: 0.0.40
codegen_flags: <defaults>
</compile_context>

<pallas_src>
import functools

import jax
import jax.numpy as jnp
from jax import lax
from jax.experimental import pallas as pl
from jax.experimental.pallas import tpu as pltpu


def _round_up(x, m):
    return ((x + m - 1) // m) * m


def _flash_attn_kernel(*refs, has_bias):
    # Refs (in order): q [1,tq,D], k [1,D,tk], v [1,tk,dv_p], (bias [1,tk]),
    #                  out [1,dv_p,tq], m [tq,1], l [tq,1], acc [tq,dv_p].
    if has_bias:
        q_ref, k_ref, v_ref, bias_ref, o_ref, m_sc, l_sc, acc_sc = refs
    else:
        q_ref, k_ref, v_ref, o_ref, m_sc, l_sc, acc_sc = refs
        bias_ref = None

    ki = pl.program_id(2)

    @pl.when(ki == 0)
    def _init():
        m_sc[...] = jnp.full(m_sc.shape, -jnp.inf, dtype=jnp.float32)
        l_sc[...] = jnp.zeros(l_sc.shape, dtype=jnp.float32)
        acc_sc[...] = jnp.zeros(acc_sc.shape, dtype=jnp.float32)

    q = q_ref[0]  # [tq, D]    pre-normalized, alpha folded in, MXU dtype
    k = k_ref[0]  # [D, tk]    pre-normalized, MXU dtype
    v = v_ref[0]  # [tk, dv_p] MXU dtype

    # scores[tq, tk] = (alpha * q_norm)^T k_norm  -- plain MXU matmul, f32 acc.
    s = jnp.dot(q, k, preferred_element_type=jnp.float32)
    if has_bias:
        # [1, tk] additive bias: 0 for valid keys, -1e30 for padded keys.
        s = s + bias_ref[...]

    # Online (flash) softmax update over the key-tile axis (all f32).
    m_prev = m_sc[...]
    m_new = jnp.maximum(m_prev, jnp.max(s, axis=-1, keepdims=True))
    corr = jnp.exp(m_prev - m_new)
    p = jnp.exp(s - m_new)  # [tq, tk]
    l_sc[...] = corr * l_sc[...] + jnp.sum(p, axis=-1, keepdims=True)
    acc_sc[...] = corr * acc_sc[...] + jnp.dot(
        p.astype(v.dtype), v, preferred_element_type=jnp.float32)  # [tq, dv_p]
    m_sc[...] = m_new

    @pl.when(ki == pl.num_programs(2) - 1)
    def _finalize():
        # 1/l folded into the accumulator scale once per output tile; the
        # output transpose is fused here (one XLU transpose per output tile,
        # amortized over all key steps) so the kernel writes [dv_p, tq]
        # directly in the module's channel-major layout.
        inv_l = pl.reciprocal(l_sc[...], approx=True)
        out = acc_sc[...] * inv_l                     # [tq, dv_p] f32
        o_ref[0] = jnp.transpose(out).astype(o_ref.dtype)  # [dv_p, tq]


def attention(q, k, v, *, alpha=5.0, tq=512, tk=512, mxu_dtype=None):
    """Pallas cosine-attention matching Attention(n_head=1, alpha).forward(q,k,v).

    q: [B, D, Nq], k: [B, D, Nk], v: [B, Dv, Nk] -> [B, Dv, Nq].
    mxu_dtype: optional dtype for the matmul operands (e.g. jnp.bfloat16 to use
      the native bf16 MXU path when inputs are f32); accumulation stays f32.
    """
    B, D, Nq = q.shape
    Bk, Dk, Nk = k.shape
    Bv, Dv, Nkv = v.shape
    assert B == Bk == Bv and D == Dk and Nk == Nkv

    out_dtype = q.dtype
    mxu_dtype = out_dtype if mxu_dtype is None else mxu_dtype
    eps = 1e-12  # F.normalize eps

    # --- XLA-side plumbing: normalization (hoisted out of the key loop),
    #     transposes and padding fused into single passes over q / k / v. ---
    qT = jnp.swapaxes(q, 1, 2).astype(jnp.float32)                    # [B, Nq, D]
    q_norm = jnp.sqrt(jnp.sum(qT * qT, axis=-1, keepdims=True))
    qT = (qT * (float(alpha) / jnp.maximum(q_norm, eps))).astype(mxu_dtype)

    kf = k.astype(jnp.float32)                                        # [B, D, Nk]
    k_norm = jnp.sqrt(jnp.sum(kf * kf, axis=1, keepdims=True))
    kn = (kf / jnp.maximum(k_norm, eps)).astype(mxu_dtype)

    vT = jnp.swapaxes(v, 1, 2).astype(mxu_dtype)                      # [B, Nk, Dv]

    # --- Tile sizes: multiples of 128 (MXU / lane granularity, keeps every
    #     BlockSpec dim aligned and output stores lane-dense). ---
    nq_ru = _round_up(Nq, 128)
    tq = min(max(128, (int(tq) // 128) * 128), nq_ru)
    nq_p = _round_up(Nq, tq)

    nk_ru = _round_up(Nk, 128)
    tk = min(max(128, (int(tk) // 128) * 128), nk_ru)
    nk_p = _round_up(Nk, tk)

    dv_p = _round_up(Dv, 128)  # lane-dense v tiles / accumulator

    if nq_p != Nq:
        qT = jnp.pad(qT, ((0, 0), (0, nq_p - Nq), (0, 0)))
    if nk_p != Nk:
        kn = jnp.pad(kn, ((0, 0), (0, 0), (0, nk_p - Nk)))
        vT = jnp.pad(vT, ((0, 0), (0, nk_p - Nk), (0, 0)))
    if dv_p != Dv:
        vT = jnp.pad(vT, ((0, 0), (0, 0), (0, dv_p - Dv)))

    has_bias = nk_p != Nk

    inputs = [qT, kn, vT]
    in_specs = [
        pl.BlockSpec((1, tq, D), lambda b, qi, ki: (b, qi, 0)),      # q tile
        pl.BlockSpec((1, D, tk), lambda b, qi, ki: (b, 0, ki)),      # k tile
        pl.BlockSpec((1, tk, dv_p), lambda b, qi, ki: (b, ki, 0)),   # v tile
    ]
    if has_bias:
        key_pos = jnp.arange(nk_p, dtype=jnp.int32)[None, :]         # [1, nk_p]
        key_bias = jnp.where(key_pos < Nk, 0.0, -1e30).astype(jnp.float32)
        inputs.append(key_bias)
        in_specs.append(pl.BlockSpec((1, tk), lambda b, qi, ki: (0, ki)))

    grid = (B, nq_p // tq, nk_p // tk)

    # VMEM budget: double-buffered input/output tiles + f32 scratch + headroom
    # for the [tq, tk] score/prob intermediates.  Clamped to stay within every
    # generation's physical VMEM (v7x: 64 MiB) while exceeding the small
    # scoped defaults (v5e 16 MiB / v7x 32 MiB) when the tiles need it.
    isz = jnp.dtype(mxu_dtype).itemsize
    need = (2 * (tq * D + D * tk + tk * dv_p) * isz
            + 2 * dv_p * tq * jnp.dtype(out_dtype).itemsize
            + (tq * dv_p + 2 * tq) * 4
            + 4 * tq * tk * 4)
    vmem_limit = int(min(max(2 * need + (8 << 20), 32 << 20), 64 << 20))

    out_padded = pl.pallas_call(
        functools.partial(_flash_attn_kernel, has_bias=has_bias),
        out_shape=jax.ShapeDtypeStruct((B, dv_p, nq_p), out_dtype),
        grid=grid,
        in_specs=in_specs,
        out_specs=pl.BlockSpec((1, dv_p, tq), lambda b, qi, ki: (b, 0, qi)),
        scratch_shapes=[
            pltpu.VMEM((tq, 1), jnp.float32),      # running max
            pltpu.VMEM((tq, 1), jnp.float32),      # running sum
            pltpu.VMEM((tq, dv_p), jnp.float32),   # output accumulator
        ],
        compiler_params=pltpu.CompilerParams(
            dimension_semantics=("parallel", "parallel", "arbitrary"),
            vmem_limit_bytes=vmem_limit,
        ),
    )(*inputs)

    # Kernel already produced the module's [B, Dv, Nq] layout; strip padding.
    return out_padded[:, :Dv, :Nq]


def attention_reference(q, k, v, *, alpha=5.0):
    """Pure-JAX reference replicating the PyTorch forward exactly."""
    eps = 1e-12
    qn = q / jnp.maximum(jnp.sqrt(jnp.sum(q * q, axis=-2, keepdims=True)), eps)
    kn = k / jnp.maximum(jnp.sqrt(jnp.sum(k * k, axis=-2, keepdims=True)), eps)
    qk = alpha * jnp.einsum("bdq,bdk->bqk", qn, kn)
    sm = jax.nn.softmax(qk, axis=-1)
    # (sm.unsqueeze(-3) * v.unsqueeze(-2)).sum(-1)
    return jnp.einsum("bqk,bvk->bvq", sm, v)


if __name__ == "__main__":
    key = jax.random.PRNGKey(0)
    kq, kk, kv = jax.random.split(key, 3)

    # Case A: ragged shapes exercising multi-tile q/k, padded-key bias path
    # and padded Dv output lanes.
    B, D, Nq, Nk, Dv = 2, 64, 192, 160, 96
    q = jax.random.normal(kq, (B, D, Nq), dtype=jnp.float32)
    k = jax.random.normal(kk, (B, D, Nk), dtype=jnp.float32)
    v = jax.random.normal(kv, (B, Dv, Nk), dtype=jnp.float32)

    out_a = jax.block_until_ready(attention(q, k, v, alpha=5.0, tq=128, tk=128))
    ref_a = attention_reference(q, k, v, alpha=5.0)
    assert out_a.shape == (B, Dv, Nq), out_a.shape
    # Tolerance accounts for the approx (EUP) reciprocal in the softmax finalize.
    assert jnp.allclose(out_a, ref_a, atol=2e-3, rtol=2e-3), \
        float(jnp.max(jnp.abs(out_a - ref_a)))

    # Case B: aligned shapes with default (large) tiles, no padding / no bias.
    B2, D2, Nq2, Nk2, Dv2 = 2, 64, 256, 256, 128
    kq2, kk2, kv2 = jax.random.split(jax.random.PRNGKey(1), 3)
    q2 = jax.random.normal(kq2, (B2, D2, Nq2), dtype=jnp.float32)
    k2 = jax.random.normal(kk2, (B2, D2, Nk2), dtype=jnp.float32)
    v2 = jax.random.normal(kv2, (B2, Dv2, Nk2), dtype=jnp.float32)

    out_b = jax.block_until_ready(attention(q2, k2, v2, alpha=5.0))
    ref_b = attention_reference(q2, k2, v2, alpha=5.0)
    assert out_b.shape == (B2, Dv2, Nq2), out_b.shape
    assert jnp.allclose(out_b, ref_b, atol=2e-3, rtol=2e-3), \
        float(jnp.max(jnp.abs(out_b - ref_b)))

    print("KERNEL_OK")
</pallas_src>

<mosaic_0001>
module attributes {stable_mosaic.version = 11 : i64} {
  func.func @_flash_attn_kernel(%arg0: i32, %arg1: i32, %arg2: i32, %arg3: memref<1x128x64xf32, #tpu.memory_space<vmem>>, %arg4: memref<1x64x128xf32, #tpu.memory_space<vmem>>, %arg5: memref<1x128x128xf32, #tpu.memory_space<vmem>>, %arg6: memref<1x128xf32, #tpu.memory_space<vmem>>, %arg7: memref<1x128x128xf32, #tpu.memory_space<vmem>>, %arg8: memref<128x1xf32, #tpu.memory_space<vmem>>, %arg9: memref<128x1xf32, #tpu.memory_space<vmem>>, %arg10: memref<128x128xf32, #tpu.memory_space<vmem>>) attributes {dimension_semantics = [#tpu.dimension_semantics<parallel>, #tpu.dimension_semantics<parallel>, #tpu.dimension_semantics<arbitrary>], iteration_bounds = array<i64: 2, 2, 2>, scalar_prefetch = 0 : i64, scratch_operands = 3 : i64, tpu.core_type = #tpu.core_type<tc>, window_params = [{transform_indices = @transform_0, window_bounds = array<i64: 1, 128, 64>}, {transform_indices = @transform_1, window_bounds = array<i64: 1, 64, 128>}, {transform_indices = @transform_2, window_bounds = array<i64: 1, 128, 128>}, {transform_indices = @transform_3, window_bounds = array<i64: 1, 128>}, {transform_indices = @transform_4, window_bounds = array<i64: 1, 128, 128>}]} {
    %c0_i32 = arith.constant 0 : i32
    %0 = arith.cmpi eq, %arg2, %c0_i32 : i32
    %1 = arith.extui %0 : i1 to i32
    %c0_i32_0 = arith.constant 0 : i32
    %2 = arith.cmpi ne, %1, %c0_i32_0 : i32
    scf.if %2 {
      %cst_27 = arith.constant 0xFF800000 : f32
      %38 = vector.broadcast %cst_27 : f32 to vector<128x1xf32>
      %c0_28 = arith.constant 0 : index
      %c0_29 = arith.constant 0 : index
      %39 = vector.load %arg8[%c0_28, %c0_29] : memref<128x1xf32, #tpu.memory_space<vmem>>, vector<128x1xf32>
      tpu.vector_store %arg8[%c0_28, %c0_29], %38 {strides = array<i32>} : memref<128x1xf32, #tpu.memory_space<vmem>>, vector<128x1xf32>,
      %cst_30 = arith.constant 0.000000e+00 : f32
      %40 = vector.broadcast %cst_30 : f32 to vector<128x1xf32>
      %c0_31 = arith.constant 0 : index
      %c0_32 = arith.constant 0 : index
      %41 = vector.load %arg9[%c0_31, %c0_32] : memref<128x1xf32, #tpu.memory_space<vmem>>, vector<128x1xf32>
      tpu.vector_store %arg9[%c0_31, %c0_32], %40 {strides = array<i32>} : memref<128x1xf32, #tpu.memory_space<vmem>>, vector<128x1xf32>,
      %cst_33 = arith.constant 0.000000e+00 : f32
      %42 = vector.broadcast %cst_33 : f32 to vector<128x128xf32>
      %c0_34 = arith.constant 0 : index
      %c0_35 = arith.constant 0 : index
      %43 = vector.load %arg10[%c0_34, %c0_35] : memref<128x128xf32, #tpu.memory_space<vmem>>, vector<128x128xf32>
      tpu.vector_store %arg10[%c0_34, %c0_35], %42 {strides = array<i32>} : memref<128x128xf32, #tpu.memory_space<vmem>>, vector<128x128xf32>,
    } else {
    }
    %c0 = arith.constant 0 : index
    %c0_1 = arith.constant 0 : index
    %c0_2 = arith.constant 0 : index
    %3 = vector.load %arg3[%c0, %c0_1, %c0_2] : memref<1x128x64xf32, #tpu.memory_space<vmem>>, vector<1x128x64xf32>
    %4 = vector.shape_cast %3 : vector<1x128x64xf32> to vector<128x64xf32>
    %c0_3 = arith.constant 0 : index
    %c0_4 = arith.constant 0 : index
    %c0_5 = arith.constant 0 : index
    %5 = vector.load %arg4[%c0_3, %c0_4, %c0_5] : memref<1x64x128xf32, #tpu.memory_space<vmem>>, vector<1x64x128xf32>
    %6 = vector.shape_cast %5 : vector<1x64x128xf32> to vector<64x128xf32>
    %c0_6 = arith.constant 0 : index
    %c0_7 = arith.constant 0 : index
    %c0_8 = arith.constant 0 : index
    %7 = vector.load %arg5[%c0_6, %c0_7, %c0_8] : memref<1x128x128xf32, #tpu.memory_space<vmem>>, vector<1x128x128xf32>
    %8 = vector.shape_cast %7 : vector<1x128x128xf32> to vector<128x128xf32>
    %cst = arith.constant dense<0.000000e+00> : vector<128x128xf32>
    %9 = tpu.matmul %4, %6, %cst {dimension_numbers = #tpu.dot_dimension_numbers<[1], [0], [0], [1], [0, 0, 1, 1], [], []>} : vector<128x64xf32>, vector<64x128xf32>, vector<128x128xf32> -> vector<128x128xf32>
    %c0_9 = arith.constant 0 : index
    %c0_10 = arith.constant 0 : index
    %10 = vector.load %arg6[%c0_9, %c0_10] : memref<1x128xf32, #tpu.memory_space<vmem>>, vector<1x128xf32>
    %11 = vector.broadcast %10 : vector<1x128xf32> to vector<128x128xf32>
    %12 = arith.addf %9, %11 : vector<128x128xf32>
    %c0_11 = arith.constant 0 : index
    %c0_12 = arith.constant 0 : index
    %13 = vector.load %arg8[%c0_11, %c0_12] : memref<128x1xf32, #tpu.memory_space<vmem>>, vector<128x1xf32>
    %cst_13 = arith.constant dense<0xFF800000> : vector<128xf32>
    %14 = vector.multi_reduction <maximumf>, %12, %cst_13 [1] : vector<128x128xf32> to vector<128xf32>
    %15 = vector.shape_cast %14 : vector<128xf32> to vector<128x1xf32>
    %16 = arith.maximumf %13, %15 : vector<128x1xf32>
    %17 = arith.subf %13, %16 : vector<128x1xf32>
    %18 = math.exp %17 : vector<128x1xf32>
    %19 = vector.broadcast %16 : vector<128x1xf32> to vector<128x128xf32>
    %20 = arith.subf %12, %19 : vector<128x128xf32>
    %21 = math.exp %20 : vector<128x128xf32>
    %c0_14 = arith.constant 0 : index
    %c0_15 = arith.constant 0 : index
    %22 = vector.load %arg9[%c0_14, %c0_15] : memref<128x1xf32, #tpu.memory_space<vmem>>, vector<128x1xf32>
    %23 = arith.mulf %18, %22 : vector<128x1xf32>
    %cst_16 = arith.constant dense<0.000000e+00> : vector<128xf32>
    %24 = vector.multi_reduction <add>, %21, %cst_16 [1] : vector<128x128xf32> to vector<128xf32>
    %25 = vector.shape_cast %24 : vector<128xf32> to vector<128x1xf32>
    %26 = arith.addf %23, %25 : vector<128x1xf32>
    %c0_17 = arith.constant 0 : index
    %c0_18 = arith.constant 0 : index
    %27 = vector.load %arg9[%c0_17, %c0_18] : memref<128x1xf32, #tpu.memory_space<vmem>>, vector<128x1xf32>
    tpu.vector_store %arg9[%c0_17, %c0_18], %26 {strides = array<i32>} : memref<128x1xf32, #tpu.memory_space<vmem>>, vector<128x1xf32>,
    %c0_19 = arith.constant 0 : index
    %c0_20 = arith.constant 0 : index
    %28 = vector.load %arg10[%c0_19, %c0_20] : memref<128x128xf32, #tpu.memory_space<vmem>>, vector<128x128xf32>
    %29 = vector.broadcast %18 : vector<128x1xf32> to vector<128x128xf32>
    %30 = arith.mulf %29, %28 : vector<128x128xf32>
    %cst_21 = arith.constant dense<0.000000e+00> : vector<128x128xf32>
    %31 = tpu.matmul %21, %8, %cst_21 {dimension_numbers = #tpu.dot_dimension_numbers<[1], [0], [0], [1], [0, 0, 1, 1], [], []>} : vector<128x128xf32>, vector<128x128xf32>, vector<128x128xf32> -> vector<128x128xf32>
    %32 = arith.addf %30, %31 : vector<128x128xf32>
    %c0_22 = arith.constant 0 : index
    %c0_23 = arith.constant 0 : index
    %33 = vector.load %arg10[%c0_22, %c0_23] : memref<128x128xf32, #tpu.memory_space<vmem>>, vector<128x128xf32>
    tpu.vector_store %arg10[%c0_22, %c0_23], %32 {strides = array<i32>} : memref<128x128xf32, #tpu.memory_space<vmem>>, vector<128x128xf32>,
    %c0_24 = arith.constant 0 : index
    %c0_25 = arith.constant 0 : index
    %34 = vector.load %arg8[%c0_24, %c0_25] : memref<128x1xf32, #tpu.memory_space<vmem>>, vector<128x1xf32>
    tpu.vector_store %arg8[%c0_24, %c0_25], %16 {strides = array<i32>} : memref<128x1xf32, #tpu.memory_space<vmem>>, vector<128x1xf32>,
    %c1_i32 = arith.constant 1 : i32
    %35 = arith.cmpi eq, %arg2, %c1_i32 : i32
    %36 = arith.extui %35 : i1 to i32
    %c0_i32_26 = arith.constant 0 : i32
    %37 = arith.cmpi ne, %36, %c0_i32_26 : i32
    scf.if %37 {
      %c0_27 = arith.constant 0 : index
      %c0_28 = arith.constant 0 : index
      %38 = vector.load %arg9[%c0_27, %c0_28] : memref<128x1xf32, #tpu.memory_space<vmem>>, vector<128x1xf32>
      %39 = tpu.reciprocal %38 {approx = true} : vector<128x1xf32> -> vector<128x1xf32>
      %c0_29 = arith.constant 0 : index
      %c0_30 = arith.constant 0 : index
      %40 = vector.load %arg10[%c0_29, %c0_30] : memref<128x128xf32, #tpu.memory_space<vmem>>, vector<128x128xf32>
      %41 = vector.broadcast %39 : vector<128x1xf32> to vector<128x128xf32>
      %42 = arith.mulf %40, %41 : vector<128x128xf32>
      %43 = tpu.transpose %42, [1, 0] : vector<128x128xf32> -> vector<128x128xf32>
      %c0_31 = arith.constant 0 : index
      %c0_32 = arith.constant 0 : index
      %c0_33 = arith.constant 0 : index
      %44 = vector.load %arg7[%c0_31, %c0_32, %c0_33] : memref<1x128x128xf32, #tpu.memory_space<vmem>>, vector<1x128x128xf32>
      %45 = vector.shape_cast %44 : vector<1x128x128xf32> to vector<128x128xf32>
      %46 = vector.shape_cast %43 : vector<128x128xf32> to vector<1x128x128xf32>
      tpu.vector_store %arg7[%c0_31, %c0_32, %c0_33], %46 {strides = array<i32>} : memref<1x128x128xf32, #tpu.memory_space<vmem>>, vector<1x128x128xf32>,
    } else {
    }
    return
  }
  func.func @transform_0(%arg0: i32, %arg1: i32, %arg2: i32) -> (i32, i32, i32) {
    %c0_i32 = arith.constant 0 : i32
    %c0_i32_0 = arith.constant 0 : i32
    return %arg0, %arg1, %c0_i32 : i32, i32, i32
  }
  func.func @transform_1(%arg0: i32, %arg1: i32, %arg2: i32) -> (i32, i32, i32) {
    %c0_i32 = arith.constant 0 : i32
    %c0_i32_0 = arith.constant 0 : i32
    return %arg0, %c0_i32, %arg2 : i32, i32, i32
  }
  func.func @transform_2(%arg0: i32, %arg1: i32, %arg2: i32) -> (i32, i32, i32) {
    %c0_i32 = arith.constant 0 : i32
    %c0_i32_0 = arith.constant 0 : i32
    return %arg0, %arg2, %c0_i32 : i32, i32, i32
  }
  func.func @transform_3(%arg0: i32, %arg1: i32, %arg2: i32) -> (i32, i32) {
    %c0_i32 = arith.constant 0 : i32
    %c0_i32_0 = arith.constant 0 : i32
    return %c0_i32, %arg2 : i32, i32
  }
  func.func @transform_4(%arg0: i32, %arg1: i32, %arg2: i32) -> (i32, i32, i32) {
    %c0_i32 = arith.constant 0 : i32
    %c0_i32_0 = arith.constant 0 : i32
    return %arg0, %c0_i32, %arg1 : i32, i32, i32
  }
}

</mosaic_0001>

<bundles_post_ra>
// kernel: tpu_custom_call.1
= control target key start
LH: loop header
LB: loop body
LE: loop exit
PB: predicated region body
PF: predicated region fallthrough
CT: control target
= control target key end

     0   :  { %s2944_s0 = inlined_call_operand.vmem [shape: f32[2,256,64], index: 0, kind: input, shape index: {}]   ;;  %s2945_s1 = inlined_call_operand.vmem [shape: f32[2,64,256], index: 1, kind: input, shape index: {}]   ;;  %s2946_s2 = inlined_call_operand.vmem [shape: f32[2,256,128], index: 2, kind: input, shape index: {}]   ;;  %s2947_s3 = inlined_call_operand.vmem [shape: f32[1,256], index: 3, kind: input, shape index: {}]   ;;  %s2948_s4 = inlined_call_operand.hbm [shape: f32[2,128,256], index: 4, kind: output, shape index: {}]  }
   0x1   :  { %2957 = sst [smem:[#allocation18_spill]] %s2945_s1 }
   0x2   :  { %9 = vsyncpa [#allocation7], 0 }
   0x3   :  { %11 = vsyncpa [#allocation7 + $0x1], 0  ;;  %s2277_s15 = smov 0   ;;  %s2279_s16 = smov 0  }
   0x4   :  { %s2281_s17 = smov 0   ;;  %s2283_s18 = smov 0  }
   0x5   :  { %s2285_s19 = smov 0   ;;  %s2287_s20 = smov 0  }
   0x6   :  { %s2289_s21 = smov 0   ;;  %s2291_s22 = smov 0  }
   0x7   :  { %s2293_s23 = smov 0   ;;  %s2295_s24 = smov 0  }
   0x8   :  { %s2297_s25 = smov 0   ;;  %s2299_s26 = smov 0  }
   0x9 LB: > { %2958 = sst [smem:[#allocation9_spill]] %s2214_s19  ;;  %s1650_s27 = sadd.s32 4294967295, %s2242_s26   ;;  %s2242_s26 = sphi %s2299_s26, %s17_s26   ;;  %s2238_s25 = sphi %s2297_s25, %s2980_s25   ;;  %s2234_s24 = sphi %s2295_s24, %s2979_s24   ;;  %s2230_s23 = sphi %s2293_s23, %s2978_s23   ;;  %s2226_s22 = sphi %s2291_s22, %s2977_s22   ;;  %s2222_s21 = sphi %s2289_s21, %s2976_s21   ;;  %s2218_s20 = sphi %s2287_s20, %s2975_s20   ;;  %s2214_s19 = sphi %s2285_s19, %s2974_s19   ;;  %s2210_s18 = sphi %s2283_s18, %s2973_s18   ;;  %s2206_s17 = sphi %s2281_s17, %s2983_s17   ;;  %s2202_s16 = sphi %s2279_s16, %s2982_s16   ;;  %s2198_s15 = sphi %s2277_s15, %s2981_s15  }
   0xa   : > { %2959 = sst [smem:[#allocation10_spill]] %s2230_s23  ;;  %s29_s28 = sadd.s32 1, %s2230_s23 }
   0xb   : > { %2960 = sst [smem:[#allocation11_spill]] %s2234_s24  ;;  %p30_p0 = scmp.ge.s32.totalorder %s29_s28, 2 }
   0xc   : > { %2961 = sst [smem:[#allocation12_spill]] %s2238_s25  ;;  %s32_s29 = sadd.s32 1, %s2234_s24 }
   0xd   : > { %s1651_s30 = sadd.s32 4294967294, %s2242_s26   ;;  %p80_p1 = scmp.ne.s32.totalorder %s2214_s19, %s2210_s18 }
   0xe   : > { %s2985_s28 = smov (%p30_p0, %s29_s28), 0  ;;  %s2987_s29 = smov (!%p30_p0, %s32_s29), %s2234_s24 }
   0xf   : > { %2962 = sst [smem:[#allocation13_spill]] %s2985_s28  ;;  %s36_s5 = sadd.s32 1, %s2238_s25 }
  0x10   : > { %p81_p2 = scmp.eq.s32.totalorder %s2242_s26, 0  ;;  %p34_p3 = scmp.ge.s32.totalorder %s2987_s29, 2 }
  0x11   : > { %s69_s6 = ssub.s32 %s2230_s23, %s2985_s28  ;;  %p165_p5 = scmp.ne.s32.totalorder %s2206_s17, %s2202_s16 }
  0x12   : > { %p2350_p4 = por %p81_p2, %p80_p1  ;;  %s2989_s29 = smov (%p34_p3, %s2987_s29), 0 }
  0x13   : > { %2964 = sst [smem:[#allocation14_spill]] %s2989_s29  ;;  %s2991_s5 = smov (!%p34_p3, %s36_s5), %s2238_s25 }
  0x14   : > { %s151_s8 = ssub.s32 %s2234_s24, %s2989_s29  ;;  %p166_p6 = scmp.eq.s32.totalorder %s1650_s27, 7 }
  0x15   : > { %p38_p7 = scmp.ge.s32.totalorder %s2991_s5, 2  ;;  %p171_p8 = scmp.ne.s32.totalorder %s2202_s16, %s2198_s15 }
  0x16   : > { %p2363_p9 = por %p166_p6, %p165_p5  ;;  %p172_p10 = scmp.eq.s32.totalorder %s1651_s30, 7 }
  0x17   : > { %s2993_s5 = smov (%p38_p7, %s2991_s5), 0  ;;  %s73_s10 = sadd.s32 1, %s2214_s19 }
  0x18   : > { %2966 = sst [smem:[#allocation15_spill]] %s2993_s5  ;;  %p2370_p11 = por %p172_p10, %p171_p8 }
  0x19   : > { %s68_s12 = ssub.s32 %s2238_s25, %s2993_s5  ;;  %s155_s13 = sadd.s32 1, %s2206_s17 }
  0x1a   : > { %s70_s14 = sor.u32 %s69_s6, %s68_s12  ;;  %s152_s29 = sor.u32 %s151_s8, %s68_s12 }
  0x1b   : > { %p71_p12 = scmp.eq.s32.totalorder %s70_s14, 0  ;;  %p153_p13 = scmp.eq.s32.totalorder %s152_s29, 0 }
  0x1c   : > { %p1653_p0 = scmp.ge.s32.totalorder %s2242_s26, 8 }
  0x1d   : > { %s2378_s27 = scalar_select %p71_p12, %s2214_s19, %s73_s10  }
  0x1e   : > { %s2381_s28 = scalar_select %p153_p13, %s2206_s17, %s155_s13  }
  0x1f   : > { %2968 = sst [smem:[#allocation16_spill]] %s2378_s27  ;;  %188 = sbr.rel (%p1653_p0) target bundleno = 52 (0x34), region = 16 }
  0x20   : > { %2969 = sst [smem:[#allocation17_spill]] %s2381_s28 }
  0x26   : > { %204 = sbr.rel (!%p2350_p4) target bundleno = 52 (0x34), region = 24  ;;  %s206_s30 = sand.u32 (%p2350_p4), 1, %s2214_s19  }
  0x27   : > { %s1655_s5 = sshll.u32 (%p2350_p4), %s2238_s25, 4  ;;  %s1654_s24 = sshll.u32 (%p2350_p4), %s206_s30, 6 }
  0x28   : > { %s210_s6 = sadd.s32 (%p2350_p4), %s2230_s23, %s1655_s5  ;;  %s2970_s1 = sld [smem:[#allocation18_spill]] (%p2350_p4) }
  0x29   : > { %s1656_s8 = sshll.u32 (%p2350_p4), %s210_s6, 3  ;;  %s208_s13 = scalar_lea.vmem (%p2350_p4), [#allocation5], %s1654_s24 }
  0x2e   : > { %s212_s10 = scalar_lea.vmem %s2970_s1, %s1656_s8 }
  0x2f   : > { %v254_v0 = vld [vmem:[%s212_s10] sm:$0xff]  ;;  %v256_v1 = vld [vmem:[%s212_s10 + $0x10] sm:$0xff] }
  0x30   : > { %v258_v2 = vld [vmem:[%s212_s10 + $0x20] sm:$0xff]  ;;  %255 = vst [vmem:[%s208_s13] sm:$0xff] %v254_v0  ;;  %257 = vst [vmem:[%s208_s13 + $0x8] sm:$0xff] %v256_v1  ;;  %v260_v3 = vld [vmem:[%s212_s10 + $0x30] sm:$0xff] }
  0x31   : > { %259 = vst [vmem:[%s208_s13 + $0x10] sm:$0xff] %v258_v2  ;;  %v262_v4 = vld [vmem:[%s212_s10 + $0x40] sm:$0xff]  ;;  %v264_v5 = vld [vmem:[%s212_s10 + $0x50] sm:$0xff]  ;;  %261 = vst [vmem:[%s208_s13 + $0x18] sm:$0xff] %v260_v3 }
  0x32   : > { %263 = vst [vmem:[%s208_s13 + $0x20] sm:$0xff] %v262_v4  ;;  %265 = vst [vmem:[%s208_s13 + $0x28] sm:$0xff] %v264_v5  ;;  %v266_v6 = vld [vmem:[%s212_s10 + $0x60] sm:$0xff]  ;;  %v268_v7 = vld [vmem:[%s212_s10 + $0x70] sm:$0xff] }
  0x33   : > { %267 = vst [vmem:[%s208_s13 + $0x30] sm:$0xff] %v266_v6  ;;  %269 = vst [vmem:[%s208_s13 + $0x38] sm:$0xff] %v268_v7 }
  0x34 PF: > { %p1657_p1 = scmp.ge.s32.totalorder %s2242_s26, 1  ;;  %p293_p2 = scmp.lt.s32.totalorder %s2242_s26, 9 }
  0x36   : > { %p294_p3 = pnand %p1657_p1, %p293_p2 }
  0x37   : > { %s300_s24 = sand.u32 (!%p294_p3), 1, %s2210_s18   ;;  %s2953_s5 = sand.u32 (!%p294_p3), 1, %s2202_s16  }
  0x38   : > { %297 = sbr.rel (%p294_p3) target bundleno = 1199 (0x4af), region = 70  ;;  %s1658_s7 = sshll.u32 (!%p294_p3), %s300_s24, 6 }
  0x39   : > { %s1659_s14 = sshll.u32 (!%p294_p3), %s2953_s5, 7  ;;  %s1660_s30 = sshll.u32 (!%p294_p3), %s2222_s21, 4 }
  0x3a   : > { %p347_p4 = scmp.lt.s32.totalorder (!%p294_p3), %s2226_s22, 1  ;;  %p349_p5 = scmp.lt.s32.totalorder (!%p294_p3), %s1660_s30, 31 }
  0x3b   : > { %s1663_s6 = sshll.u32 (!%p294_p3), %s2218_s20, 4  ;;  %p366_p7 = scmp.lt.s32.totalorder (!%p294_p3), %s2218_s20, 1 }
  0x3c   : > { %p359_p6 = scmp.lt.s32.totalorder (!%p294_p3), %s1663_s6, 31  ;;  %s2422_s1 = scalar_lea.vmem (!%p294_p3), [#allocation6], %s1659_s14 }
  0x3d   : > { %p1666_p8 = scmp.ne.s32.totalorder (!%p294_p3), %s2218_s20, 0 }
  0x3f   : > { %s348_s8 = scalar_select %p347_p4, %s2226_s22, 1 }
  0x40   : > { %s2995_s30 = smov (!%p349_p5, %s1660_s30), 31  ;;  %s2997_s6 = smov (!%p359_p6, %s1663_s6), 31 }
  0x41   : > { %s1661_s12 = sshll.u32 %s348_s8, 5  ;;  %372 = sbr.rel (%p1666_p8) target bundleno = 91 (0x5b), region = 78  ;;  %vm373_vm0 = vcmask (!%p1666_p8), 7168   ;;  %v2244_v8 = vmov (!%p1666_p8), -inf   ;;  %v2245_v9 = vmov (!%p1666_p8), 0.0  }
  0x42   : > { %s352_s29 = sadd.s32 %s1661_s12, %s2995_s30  ;;  %s362_s5 = sadd.s32 %s1661_s12, %s2997_s6  ;;  %374 = vst.msk [vmem:[#allocation2] sm:$0xff] (!%p1666_p8), %vm373_vm0, %v2244_v8  ;;  %375 = vst.msk [vmem:[#allocation2 + $0x8] sm:$0xff] (!%p1666_p8), %vm373_vm0, %v2244_v8 }
  0x43   : > { %s1662_s10 = sshll.u32 %s352_s29, 3  ;;  %s1665_s25 = sshll.u32 %s362_s5, 3  ;;  %376 = vst.msk [vmem:[#allocation2 + $0x10] sm:$0xff] (!%p1666_p8), %vm373_vm0, %v2244_v8  ;;  %377 = vst.msk [vmem:[#allocation2 + $0x18] sm:$0xff] (!%p1666_p8), %vm373_vm0, %v2244_v8 }
  0x44   : > { %s2406_s18 = scalar_lea.vmem %s2944_s0, %s1662_s10  ;;  %s2418_s30 = scalar_lea.vmem %s2946_s2, %s1665_s25  ;;  %378 = vst.msk [vmem:[#allocation2 + $0x20] sm:$0xff] (!%p1666_p8), %vm373_vm0, %v2244_v8  ;;  %379 = vst.msk [vmem:[#allocation2 + $0x28] sm:$0xff] (!%p1666_p8), %vm373_vm0, %v2244_v8 }
  0x45   : > { %s2409_s24 = scalar_select %p366_p7, %s2218_s20, 1 }
  0x46   : > { %s2420_s29 = scalar_lea.vmem [#allocation5], %s1658_s7  ;;  %380 = vst.msk [vmem:[#allocation2 + $0x30] sm:$0xff] (!%p1666_p8), %vm373_vm0, %v2244_v8  ;;  %381 = vst.msk [vmem:[#allocation2 + $0x38] sm:$0xff] (!%p1666_p8), %vm373_vm0, %v2244_v8 }
  0x47   : > { %s368_s19 = scalar_lea.vmem %s2947_s3, %s2409_s24  ;;  %382 = vst.msk [vmem:[#allocation2 + $0x40] sm:$0xff] (!%p1666_p8), %vm373_vm0, %v2244_v8  ;;  %383 = vst.msk [vmem:[#allocation2 + $0x48] sm:$0xff] (!%p1666_p8), %vm373_vm0, %v2244_v8 }
  0x48   : > { %384 = vst.msk [vmem:[#allocation2 + $0x50] sm:$0xff] %vm373_vm0, %v2244_v8  ;;  %385 = vst.msk [vmem:[#allocation2 + $0x58] sm:$0xff] %vm373_vm0, %v2244_v8 }
  0x49   : > { %386 = vst.msk [vmem:[#allocation2 + $0x60] sm:$0xff] %vm373_vm0, %v2244_v8  ;;  %387 = vst.msk [vmem:[#allocation2 + $0x68] sm:$0xff] %vm373_vm0, %v2244_v8 }
  0x4a   : > { %388 = vst.msk [vmem:[#allocation2 + $0x70] sm:$0xff] %vm373_vm0, %v2244_v8  ;;  %389 = vst.msk [vmem:[#allocation2 + $0x78] sm:$0xff] %vm373_vm0, %v2244_v8 }
  0x4b   : > { %390 = vst.msk [vmem:[#allocation3] sm:$0xff] %vm373_vm0, %v2245_v9  ;;  %391 = vst.msk [vmem:[#allocation3 + $0x8] sm:$0xff] %vm373_vm0, %v2245_v9 }
  0x4c   : > { %392 = vst.msk [vmem:[#allocation3 + $0x10] sm:$0xff] %vm373_vm0, %v2245_v9  ;;  %393 = vst.msk [vmem:[#allocation3 + $0x18] sm:$0xff] %vm373_vm0, %v2245_v9 }
  0x4d   : > { %394 = vst.msk [vmem:[#allocation3 + $0x20] sm:$0xff] %vm373_vm0, %v2245_v9  ;;  %395 = vst.msk [vmem:[#allocation3 + $0x28] sm:$0xff] %vm373_vm0, %v2245_v9 }
  0x4e   : > { %396 = vst.msk [vmem:[#allocation3 + $0x30] sm:$0xff] %vm373_vm0, %v2245_v9  ;;  %397 = vst.msk [vmem:[#allocation3 + $0x38] sm:$0xff] %vm373_vm0, %v2245_v9 }
  0x4f   : > { %398 = vst.msk [vmem:[#allocation3 + $0x40] sm:$0xff] %vm373_vm0, %v2245_v9  ;;  %399 = vst.msk [vmem:[#allocation3 + $0x48] sm:$0xff] %vm373_vm0, %v2245_v9 }
  0x50   : > { %400 = vst.msk [vmem:[#allocation3 + $0x50] sm:$0xff] %vm373_vm0, %v2245_v9  ;;  %401 = vst.msk [vmem:[#allocation3 + $0x58] sm:$0xff] %vm373_vm0, %v2245_v9 }
  0x51   : > { %402 = vst.msk [vmem:[#allocation3 + $0x60] sm:$0xff] %vm373_vm0, %v2245_v9  ;;  %403 = vst.msk [vmem:[#allocation3 + $0x68] sm:$0xff] %vm373_vm0, %v2245_v9 }
  0x52   : > { %404 = vst.msk [vmem:[#allocation3 + $0x70] sm:$0xff] %vm373_vm0, %v2245_v9  ;;  %405 = vst.msk [vmem:[#allocation3 + $0x78] sm:$0xff] %vm373_vm0, %v2245_v9 }
  0x53   : > { %406 = vst [vmem:[#allocation4] sm:$0xff] %v2245_v9  ;;  %407 = vst [vmem:[#allocation4 + $0x8] sm:$0xff] %v2245_v9 }
  0x54   : > { %408 = vst [vmem:[#allocation4 + $0x10] sm:$0xff] %v2245_v9  ;;  %409 = vst [vmem:[#allocation4 + $0x18] sm:$0xff] %v2245_v9 }
  0x55   : > { %410 = vst [vmem:[#allocation4 + $0x20] sm:$0xff] %v2245_v9  ;;  %411 = vst [vmem:[#allocation4 + $0x28] sm:$0xff] %v2245_v9 }
  0x56   : > { %412 = vst [vmem:[#allocation4 + $0x30] sm:$0xff] %v2245_v9  ;;  %413 = vst [vmem:[#allocation4 + $0x38] sm:$0xff] %v2245_v9 }
  0x57   : > { %414 = vst [vmem:[#allocation4 + $0x40] sm:$0xff] %v2245_v9  ;;  %415 = vst [vmem:[#allocation4 + $0x48] sm:$0xff] %v2245_v9 }
  0x58   : > { %416 = vst [vmem:[#allocation4 + $0x50] sm:$0xff] %v2245_v9  ;;  %417 = vst [vmem:[#allocation4 + $0x58] sm:$0xff] %v2245_v9 }
  0x59   : > { %418 = vst [vmem:[#allocation4 + $0x60] sm:$0xff] %v2245_v9  ;;  %419 = vst [vmem:[#allocation4 + $0x68] sm:$0xff] %v2245_v9 }
  0x5a   : > { %420 = vst [vmem:[#allocation4 + $0x70] sm:$0xff] %v2245_v9  ;;  %421 = vst [vmem:[#allocation4 + $0x78] sm:$0xff] %v2245_v9 }
  0x5b PF: > { %v438_v10 = vld [vmem:[%s2420_s29] sm:$0xff]  ;;  %v439_v11 = vld [vmem:[%s2420_s29 + $0x8] sm:$0xff]  ;;  %v440_v12 = vld [vmem:[%s2420_s29 + $0x10] sm:$0xff]  ;;  %vm469_vm1 = vcmask 523264   ;;  %v2246_v62 = vmov 0   ;;  %vm983_vm2 = vcmask 7168  }
  0x5c   : > { %v1842_v13 = vpack.c.bf16 %v439_v11, %v438_v10  ;;  %v441_v14 = vld [vmem:[%s2420_s29 + $0x18] sm:$0xff]  ;;  %v442_v16 = vld [vmem:[%s2420_s29 + $0x20] sm:$0xff]  ;;  %v443_v17 = vld [vmem:[%s2420_s29 + $0x28] sm:$0xff]  ;;  %2017 = vset.pattern.permute.xlu1 %v2246_v62  ;;  %2016 = vset.pattern.permute.xlu0 %v2246_v62  ;;  %p1684_p10 = scmp.ne.s32.totalorder %s2218_s20, 1 }
  0x5d   : > { %v1846_v15 = vpack.c.bf16 %v441_v14, %v440_v12  ;;  %v422_v18 = vld [vmem:[%s2406_s18] sm:$0xff]  ;;  %v1850_v19 = vpack.c.bf16 %v443_v17, %v442_v16  ;;  %v444_v20 = vld [vmem:[%s2420_s29 + $0x30] sm:$0xff]  ;;  %v445_v21 = vld [vmem:[%s2420_s29 + $0x38] sm:$0xff] }
  0x5e   : > { %1843 = vmatprep.subr.bf16.mxu0 %v1842_v13  ;;  %1762 = vmatprep.mubr.msk.f32.mxu0 %vm469_vm1, %v422_v18  ;;  %v1854_v22 = vpack.c.bf16 %v445_v21, %v444_v20  ;;  %v423_v23 = vld [vmem:[%s2406_s18 + $0x8] sm:$0xff]  ;;  %v424_v24 = vld [vmem:[%s2406_s18 + $0x10] sm:$0xff]  ;;  %v425_v25 = vld [vmem:[%s2406_s18 + $0x18] sm:$0xff] }
  0x5f   : > { %1845 = vmatpush3.bf16.msra.mxu0 %v1842_v13  ;;  %v426_v26 = vld [vmem:[%s2406_s18 + $0x20] sm:$0xff]  ;;  %v427_v27 = vld [vmem:[%s2406_s18 + $0x28] sm:$0xff]  ;;  %v428_v28 = vld [vmem:[%s2406_s18 + $0x30] sm:$0xff] }
  0x60   : > { %1847 = vmatprep.subr.bf16.mxu0 %v1846_v15  ;;  %v429_v29 = vld [vmem:[%s2406_s18 + $0x38] sm:$0xff]  ;;  %v430_v30 = vld [vmem:[%s2406_s18 + $0x40] sm:$0xff]  ;;  %v431_v31 = vld [vmem:[%s2406_s18 + $0x48] sm:$0xff] }
  0x61   : > { %v432_v32 = vld [vmem:[%s2406_s18 + $0x50] sm:$0xff]  ;;  %v433_v33 = vld [vmem:[%s2406_s18 + $0x58] sm:$0xff]  ;;  %v434_v34 = vld [vmem:[%s2406_s18 + $0x60] sm:$0xff] }
  0x62   : > { %v435_v35 = vld [vmem:[%s2406_s18 + $0x68] sm:$0xff]  ;;  %v436_v36 = vld [vmem:[%s2406_s18 + $0x70] sm:$0xff]  ;;  %v437_v37 = vld [vmem:[%s2406_s18 + $0x78] sm:$0xff] }
  0x63   : > { %1849 = vmatpush3.bf16.msra.mxu0 %v1846_v15  ;;  %v1667_v42 = vld [vmem:[%s368_s19] ss:$0 sm:$0xff]  ;;  %v447_v9 = vld [vmem:[%s2418_s30 + $0x8] sm:$0xff]  ;;  %v448_v10 = vld [vmem:[%s2418_s30 + $0x10] sm:$0xff] }
  0x64   : > { %1851 = vmatprep.subr.bf16.mxu0 %v1850_v19  ;;  %v446_v8 = vld [vmem:[%s2418_s30] sm:$0xff]  ;;  %v449_v12 = vld [vmem:[%s2418_s30 + $0x18] sm:$0xff]  ;;  %v451_v15 = vld [vmem:[%s2418_s30 + $0x28] sm:$0xff] }
  0x65   : > { %v1858_v11 = vpack.c.bf16 %v447_v9, %v446_v8  ;;  %v1862_v13 = vpack.c.bf16 %v449_v12, %v448_v10  ;;  %v450_v14 = vld [vmem:[%s2418_s30 + $0x20] sm:$0xff]  ;;  %v2556_v17 = vld [vmem:[#allocation2 + $0x28] sm:$0xff]  ;;  %v452_v20 = vld [vmem:[%s2418_s30 + $0x30] sm:$0xff] }
  0x66   : > { %v1866_v16 = vpack.c.bf16 %v451_v15, %v450_v14  ;;  %v453_v21 = vld [vmem:[%s2418_s30 + $0x38] sm:$0xff]  ;;  %v460_v8 = vld [vmem:[%s2418_s30 + $0x70] sm:$0xff]  ;;  %v2629_v10 = vld [vmem:[#allocation2 + $0x68] sm:$0xff] }
  0x67   : > { %1853 = vmatpush3.bf16.msra.mxu0 %v1850_v19  ;;  %1890 = vmatprep.subr.bf16.mxu1 %v1858_v11  ;;  %v461_v9 = vld [vmem:[%s2418_s30 + $0x78] sm:$0xff] }
  0x68   : > { %1855 = vmatprep.subr.bf16.mxu0 %v1854_v22  ;;  %1898 = vmatpush3.bf16.msra.mxu1 %v1858_v11  ;;  %v1886_v12 = vpack.c.bf16 %v461_v9, %v460_v8 }
  0x69   : > { %1891 = vmatprep.subr.bf16.mxu1 %v1862_v13 }
  0x6b   : > { %1857 = vmatpush3.bf16.msra.mxu0 %v1854_v22  ;;  %v2563_v22 = vld [vmem:[#allocation2 + $0x38] sm:$0xff] }
  0x6c   : > { %1859 = vmatprep.subr.bf16.mxu0 %v1858_v11  ;;  %1899 = vmatpush3.bf16.msra.mxu1 %v1862_v13 }
  0x6d   : > { %1892 = vmatprep.subr.bf16.mxu1 %v1866_v16 }
  0x6e   : > { %1763 = vmatmul.mubr.msk.f32.vlgmr.msra.gmra.mrb[0].mxu0 %vm469_vm1, %v423_v23  ;;  %v2565_v23 = vld [vmem:[#allocation2 + $0x20] sm:$0xff] }
  0x6f   : > { %1765 = vmatprep.mubr.msk.f32.mxu0 %vm469_vm1, %v424_v24  ;;  %1861 = vmatpush3.bf16.msra.mxu0 %v1858_v11  ;;  %v1870_v24 = vpack.c.bf16 %v453_v21, %v452_v20  ;;  %v664_v11 = vld [vmem:[#allocation2 + $0x8] sm:$0xff]  ;;  %v665_v20 = vld [vmem:[#allocation2 + $0x10] sm:$0xff] }
  0x70   : > { %1863 = vmatprep.subr.bf16.mxu0 %v1862_v13  ;;  %1900 = vmatpush3.bf16.msra.mxu1 %v1866_v16 }
  0x71   : > { %1893 = vmatprep.subr.bf16.mxu1 %v1870_v24 }
  0x72   : > { %1766 = vmatmul.mubr.msk.f32.gmra.mrb[2].mxu0 %vm469_vm1, %v425_v25 }
  0x73   : > { %1768 = vmatprep.mubr.msk.f32.mxu0 %vm469_vm1, %v426_v26  ;;  %1865 = vmatpush3.bf16.msra.mxu0 %v1862_v13 }
  0x74   : > { %1867 = vmatprep.subr.bf16.mxu0 %v1866_v16  ;;  %1901 = vmatpush3.bf16.msra.mxu1 %v1870_v24 }
  0x76   : > { %1769 = vmatmul.mubr.msk.f32.gmra.mrb[4].mxu0 %vm469_vm1, %v427_v27 }
  0x77   : > { %1771 = vmatprep.mubr.msk.f32.mxu0 %vm469_vm1, %v428_v28  ;;  %1869 = vmatpush3.bf16.msra.mxu0 %v1866_v16 }
  0x78   : > { %1871 = vmatprep.subr.bf16.mxu0 %v1870_v24 }
  0x7a   : > { %1772 = vmatmul.mubr.msk.f32.gmra.mrb[6].mxu0 %vm469_vm1, %v429_v29  ;;  %v454_v29 = vld [vmem:[%s2418_s30 + $0x40] sm:$0xff] }
  0x7b   : > { %1774 = vmatprep.mubr.msk.f32.mxu0 %vm469_vm1, %v430_v30  ;;  %v455_v30 = vld [vmem:[%s2418_s30 + $0x48] sm:$0xff]  ;;  %1873 = vmatpush3.bf16.msra.mxu0 %v1870_v24 }
  0x7e   : > { %1775 = vmatmul.mubr.msk.f32.gmra.mrb[8].mxu0 %vm469_vm1, %v431_v31  ;;  %v2578_v31 = vld [vmem:[#allocation2 + $0x30] sm:$0xff] }
  0x7f   : > { %1777 = vmatprep.mubr.msk.f32.mxu0 %vm469_vm1, %v432_v32  ;;  %v2580_v32 = vld [vmem:[#allocation2] sm:$0xff] }
  0x82   : > { %1778 = vmatmul.mubr.msk.f32.gmra.mrb[10].mxu0 %vm469_vm1, %v433_v33  ;;  %v1874_v33 = vpack.c.bf16 %v455_v30, %v454_v29  ;;  %v2651_v30 = vld [vmem:[#allocation2 + $0x78] sm:$0xff] }
  0x83   : > { %1780 = vmatprep.mubr.msk.f32.mxu0 %vm469_vm1, %v434_v34 }
  0x84   : > { %1894 = vmatprep.subr.bf16.mxu1 %v1874_v33  ;;  %1875 = vmatprep.subr.bf16.mxu0 %v1874_v33 }
  0x85   : > { %1902 = vmatpush3.bf16.msra.mxu1 %v1874_v33  ;;  %1877 = vmatpush3.bf16.msra.mxu0 %v1874_v33  ;;  %v666_v33 = vld [vmem:[#allocation2 + $0x18] sm:$0xff] }
  0x86   : > { %1781 = vmatmul.mubr.msk.f32.gmra.mrb[12].mxu0 %vm469_vm1, %v435_v35 }
  0x87   : > { %1783 = vmatprep.mubr.msk.f32.mxu0 %vm469_vm1, %v436_v36 }
  0x8a   : > { %1784 = vmatmul.mubr.msk.f32.gmra.mrb[14].mxu0 %vm469_vm1, %v437_v37 }
 0x141   : > { %v1764_v38 = vpop.f32.mrb[0].mxu0 }
 0x142   : > { %v584_v39 = vpop.f32.mrb[1].mxu0  ;;  %v2531_v1 = vadd.f32 %v1764_v38, %v1667_v42  ;;  %v456_v38 = vld [vmem:[%s2418_s30 + $0x50] sm:$0xff] }
 0x143   : > { %v2513_v52 = vadd.f32 %v1667_v42, %v584_v39  ;;  %v457_v39 = vld [vmem:[%s2418_s30 + $0x58] sm:$0xff] }
 0x145   : > { %v1767_v40 = vpop.f32.mrb[2].mxu0 }
 0x146   : > { %v594_v41 = vpop.f32.mrb[3].mxu0  ;;  %v2543_v6 = vadd.f32 %v1767_v40, %v1667_v42  ;;  %v2595_v40 = vld [vmem:[#allocation2 + $0x48] sm:$0xff] }
 0x147   : > { %v2537_v4 = vadd.f32 %v1667_v42, %v594_v41  ;;  %v2597_v41 = vld [vmem:[#allocation2 + $0x40] sm:$0xff] }
 0x149   : > { %v1770_v43 = vpop.f32.mrb[4].mxu0 }
 0x14a   : > { %v2502_v44 = vadd.f32 %v1770_v43, %v1667_v42  ;;  %v604_v45 = vpop.f32.mrb[5].mxu0 }
 0x14b   : > { %v2505_v47 = vadd.f32 %v1667_v42, %v604_v45 }
 0x14c   : > { %689 = vmax.xlane.f32.xlu0 %v2502_v44 }
 0x14d   : > { %v1773_v46 = vpop.f32.mrb[6].mxu0 }
 0x14e   : > { %v2507_v48 = vadd.f32 %v1773_v46, %v1667_v42  ;;  %v614_v49 = vpop.f32.mrb[7].mxu0 }
 0x14f   : > { %v2511_v50 = vadd.f32 %v1667_v42, %v614_v49 }
 0x150   : > { %693 = vmax.xlane.f32.xlu1 %v2507_v48  ;;  %687 = vmax.xlane.f32.xlu0 %v2505_v47 }
 0x151   : > { %v1776_v51 = vpop.f32.mrb[8].mxu0 }
 0x152   : > { %v624_v53 = vpop.f32.mrb[9].mxu0  ;;  %v2515_v54 = vadd.f32 %v1776_v51, %v1667_v42  ;;  %v458_v51 = vld [vmem:[%s2418_s30 + $0x60] sm:$0xff] }
 0x153   : > { %v2519_v55 = vadd.f32 %v1667_v42, %v624_v53  ;;  %v459_v53 = vld [vmem:[%s2418_s30 + $0x68] sm:$0xff] }
 0x154   : > { %691 = vmax.xlane.f32.xlu1 %v2511_v50  ;;  %679 = vmax.xlane.f32.xlu0 %v2513_v52 }
 0x155   : > { %v1779_v56 = vpop.f32.mrb[10].mxu0 }
 0x156   : > { %v634_v57 = vpop.f32.mrb[11].mxu0  ;;  %v2521_v58 = vadd.f32 %v1779_v56, %v1667_v42  ;;  %v2612_v56 = vld [vmem:[#allocation2 + $0x58] sm:$0xff] }
 0x157   : > { %v2525_v59 = vadd.f32 %v1667_v42, %v634_v57  ;;  %v2614_v57 = vld [vmem:[#allocation2 + $0x50] sm:$0xff] }
 0x158   : > { %697 = vmax.xlane.f32.xlu1 %v2515_v54  ;;  %695 = vmax.xlane.f32.xlu0 %v2519_v55 }
 0x159   : > { %v1782_v60 = vpop.f32.mrb[12].mxu0 }
 0x15a   : > { %v644_v61 = vpop.f32.mrb[13].mxu0  ;;  %v2529_v63 = vadd.f32 %v1782_v60, %v1667_v42  ;;  %v1882_v60 = vpack.c.bf16 %v459_v53, %v458_v51 }
 0x15b   : > { %v2535_v3 = vadd.f32 %v1667_v42, %v644_v61 }
 0x15c   : > { %701 = vmax.xlane.f32.xlu1 %v2521_v58  ;;  %699 = vmax.xlane.f32.xlu0 %v2525_v59 }
 0x15d   : > { %v1785_v0 = vpop.f32.mrb[14].mxu0 }
 0x15e   : > { %v654_v2 = vpop.f32.mrb[15].mxu0  ;;  %v2541_v5 = vadd.f32 %v1785_v0, %v1667_v42 }
 0x15f   : > { %v2547_v7 = vadd.f32 %v1667_v42, %v654_v2  ;;  %v1878_v42 = vpack.c.bf16 %v457_v39, %v456_v38  ;;  %v2661_v39 = vld [vmem:[#allocation2 + $0x70] sm:$0xff] }
 0x160   : > { %705 = vmax.xlane.f32.xlu1 %v2529_v63  ;;  %681 = vmax.xlane.f32.xlu0 %v2531_v1 }
 0x161   : > { %1895 = vmatprep.subr.bf16.mxu1 %v1878_v42  ;;  %1879 = vmatprep.subr.bf16.mxu0 %v1878_v42 }
 0x162   : > { %1903 = vmatpush3.bf16.msra.mxu1 %v1878_v42  ;;  %1881 = vmatpush3.bf16.msra.mxu0 %v1878_v42 }
 0x163   : > { %1896 = vmatprep.subr.bf16.mxu1 %v1882_v60  ;;  %1883 = vmatprep.subr.bf16.mxu0 %v1882_v60 }
 0x164   : > { %703 = vmax.xlane.f32.xlu1 %v2535_v3  ;;  %683 = vmax.xlane.f32.xlu0 %v2537_v4 }
 0x166   : > { %1904 = vmatpush3.bf16.msra.mxu1 %v1882_v60  ;;  %1885 = vmatpush3.bf16.msra.mxu0 %v1882_v60 }
 0x167   : > { %1897 = vmatprep.subr.bf16.mxu1 %v1886_v12  ;;  %1887 = vmatprep.subr.bf16.mxu0 %v1886_v12 }
 0x168   : > { %709 = vmax.xlane.f32.xlu1 %v2541_v5  ;;  %685 = vmax.xlane.f32.xlu0 %v2543_v6 }
 0x16a   : > { %1905 = vmatpush3.bf16.msra.mxu1 %v1886_v12  ;;  %1889 = vmatpush3.bf16.msra.mxu0 %v1886_v12 }
 0x16c   : > { %707 = vmax.xlane.f32.xlu1 %v2547_v7 }
 0x1d9   : > { %v690_v18 = vpop.xlane.xlu0 %689 }
 0x1da   : > { %v2559_v19 = vmax.f32 %v2556_v17, %v690_v18  ;;  %v2639_v18 = vld [vmem:[#allocation2 + $0x60] sm:$0xff] }
 0x1dc   : > { %1294 = vst.msk [vmem:[#allocation2 + $0x28] sm:$0xff] %vm983_vm2, %v2559_v19  ;;  %802 = vperm.xlu1 %2017, %v2559_v19   ;;  %v732_v42 = vsub.f32 %v2556_v17, %v2559_v19 }
 0x1dd   : > { %v694_v25 = vpop.xlane.xlu1 %693  ;;  %v688_v26 = vpop.xlane.xlu0 %687 }
 0x1de   : > { %v2571_v27 = vmax.f32 %v2563_v22, %v694_v25  ;;  %v2574_v28 = vmax.f32 %v2565_v23, %v688_v26 }
 0x1e0   : > { %1296 = vst.msk [vmem:[#allocation2 + $0x38] sm:$0xff] %vm983_vm2, %v2571_v27  ;;  %1293 = vst.msk [vmem:[#allocation2 + $0x20] sm:$0xff] %vm983_vm2, %v2574_v28  ;;  %797 = vperm.xlu0 %2016, %v2574_v28   ;;  %v734_v17 = vsub.f32 %v2563_v22, %v2571_v27  ;;  %v731_v12 = vsub.f32 %v2565_v23, %v2574_v28 }
 0x1e1   : > { %v692_v34 = vpop.xlane.xlu1 %691  ;;  %v680_v35 = vpop.xlane.xlu0 %679 }
 0x1e2   : > { %v2588_v36 = vmax.f32 %v2578_v31, %v692_v34  ;;  %v2591_v37 = vmax.f32 %v2580_v32, %v680_v35 }
 0x1e4   : > { %1295 = vst.msk [vmem:[#allocation2 + $0x30] sm:$0xff] %vm983_vm2, %v2588_v36  ;;  %1289 = vst.msk [vmem:[#allocation2] sm:$0xff] %vm983_vm2, %v2591_v37  ;;  %777 = vperm.xlu1 %2017, %v2591_v37   ;;  %v727_v21 = vsub.f32 %v2580_v32, %v2591_v37 }
 0x1e5   : > { %v698_v43 = vpop.xlane.xlu1 %697  ;;  %v696_v45 = vpop.xlane.xlu0 %695 }
 0x1e6   : > { %v2605_v46 = vmax.f32 %v2595_v40, %v698_v43  ;;  %v2608_v49 = vmax.f32 %v2597_v41, %v696_v45  ;;  %v743_v34 = vmul.f32 1.442695, %v727_v21 }
 0x1e8   : > { %1298 = vst.msk [vmem:[#allocation2 + $0x48] sm:$0xff] %vm983_vm2, %v2605_v46  ;;  %1297 = vst.msk [vmem:[#allocation2 + $0x40] sm:$0xff] %vm983_vm2, %v2608_v49  ;;  %812 = vperm.xlu1 %2017, %v2571_v27   ;;  %2018 = vpow2.f32 %v743_v34  ;;  %v736_v22 = vsub.f32 %v2595_v40, %v2605_v46 }
 0x1e9   : > { %v702_v61 = vpop.xlane.xlu1 %701  ;;  %v700_v62 = vpop.xlane.xlu0 %699 }
 0x1ea   : > { %v2622_v0 = vmax.f32 %v2612_v56, %v702_v61  ;;  %v2625_v2 = vmax.f32 %v2614_v57, %v700_v62  ;;  %v753_v62 = vmul.f32 1.442695, %v732_v42  ;;  %v761_v21 = vmul.f32 1.442695, %v736_v22 }
 0x1ec   : > { %1300 = vst.msk [vmem:[#allocation2 + $0x58] sm:$0xff] %vm983_vm2, %v2622_v0  ;;  %1299 = vst.msk [vmem:[#allocation2 + $0x50] sm:$0xff] %vm983_vm2, %v2625_v2  ;;  %807 = vperm.xlu1 %2017, %v2588_v36   ;;  %v738_v23 = vsub.f32 %v2612_v56, %v2622_v0 }
 0x1ed   : > { %v706_v13 = vpop.xlane.xlu1 %705  ;;  %v682_v14 = vpop.xlane.xlu0 %681 }
 0x1ee   : > { %v2637_v15 = vmax.f32 %v2629_v10, %v706_v13  ;;  %v712_v16 = vmax.f32 %v664_v11, %v682_v14  ;;  %v751_v14 = vmul.f32 1.442695, %v731_v12 }
 0x1f0   : > { %1302 = vst.msk [vmem:[#allocation2 + $0x68] sm:$0xff] %vm983_vm2, %v2637_v15  ;;  %1290 = vst.msk [vmem:[#allocation2 + $0x8] sm:$0xff] %vm983_vm2, %v712_v16  ;;  %842 = vperm.xlu0 %2016, %v2637_v15   ;;  %822 = vperm.xlu1 %2017, %v2605_v46   ;;  %v728_v51 = vsub.f32 %v664_v11, %v712_v16  ;;  %v757_v11 = vmul.f32 1.442695, %v734_v17  ;;  %v735_v46 = vsub.f32 %v2597_v41, %v2608_v49 }
 0x1f1   : > { %v704_v24 = vpop.xlane.xlu1 %703  ;;  %v684_v25 = vpop.xlane.xlu0 %683  ;;  %v737_v41 = vsub.f32 %v2614_v57, %v2625_v2 }
 0x1f2   : > { %v2649_v26 = vmax.f32 %v2639_v18, %v704_v24  ;;  %v713_v29 = vmax.f32 %v665_v20, %v684_v25  ;;  %v745_v8 = vmul.f32 1.442695, %v728_v51  ;;  %v2687_v13 = vpop.eup %2018  ;;  %v759_v56 = vmul.f32 1.442695, %v735_v46 }
 0x1f4   : > { %1301 = vst.msk [vmem:[#allocation2 + $0x60] sm:$0xff] %vm983_vm2, %v2649_v26  ;;  %1291 = vst.msk [vmem:[#allocation2 + $0x10] sm:$0xff] %vm983_vm2, %v713_v29  ;;  %837 = vperm.xlu0 %2016, %v2649_v26   ;;  %817 = vperm.xlu1 %2017, %v2608_v49   ;;  %v729_v9 = vsub.f32 %v665_v20, %v713_v29  ;;  %v733_v20 = vsub.f32 %v2578_v31, %v2588_v36  ;;  %v765_v31 = vmul.f32 1.442695, %v738_v23 }
 0x1f5   : > { %v710_v32 = vpop.xlane.xlu1 %709  ;;  %v686_v35 = vpop.xlane.xlu0 %685  ;;  %v740_v36 = vsub.f32 %v2629_v10, %v2637_v15  ;;  %v763_v10 = vmul.f32 1.442695, %v737_v41  ;;  %v739_v15 = vsub.f32 %v2639_v18, %v2649_v26 }
 0x1f6   : > { %v2659_v37 = vmax.f32 %v2651_v30, %v710_v32  ;;  %v714_v38 = vmax.f32 %v666_v33, %v686_v35  ;;  %v747_v27 = vmul.f32 1.442695, %v729_v9  ;;  %v755_v40 = vmul.f32 1.442695, %v733_v20 }
 0x1f7   : > { %v769_v49 = vmul.f32 1.442695, %v740_v36  ;;  %v767_v57 = vmul.f32 1.442695, %v739_v15 }
 0x1f8   : > { %v742_v43 = vsub.f32 %v2651_v30, %v2659_v37  ;;  %1304 = vst.msk [vmem:[#allocation2 + $0x78] sm:$0xff] %vm983_vm2, %v2659_v37  ;;  %v730_v45 = vsub.f32 %v666_v33, %v714_v38  ;;  %1292 = vst.msk [vmem:[#allocation2 + $0x18] sm:$0xff] %vm983_vm2, %v714_v38  ;;  %832 = vperm.xlu1 %2017, %v2622_v0  }
 0x1f9   : > { %v708_v53 = vpop.xlane.xlu1 %707 }
 0x1fa   : > { %v749_v60 = vmul.f32 1.442695, %v730_v45  ;;  %v2672_v61 = vmax.f32 %v2661_v39, %v708_v53 }
 0x1fc   : > { %v741_v19 = vsub.f32 %v2661_v39, %v2672_v61  ;;  %1303 = vst.msk [vmem:[#allocation2 + $0x70] sm:$0xff] %vm983_vm2, %v2672_v61  ;;  %847 = vperm.xlu0 %2016, %v2672_v61   ;;  %827 = vperm.xlu1 %2017, %v2625_v2   ;;  %2020 = vpow2.f32 %v749_v60 }
 0x1fd   : > { %2022 = vpow2.f32 %v753_v62 }
 0x1fe   : > { %2024 = vpow2.f32 %v745_v8 }
 0x1ff   : > { %2026 = vpow2.f32 %v757_v11 }
 0x200   : > { %852 = vperm.xlu0 %2016, %v2659_v37   ;;  %782 = vperm.xlu1 %2017, %v712_v16   ;;  %2028 = vpow2.f32 %v747_v27 }
 0x201   : > { %2030 = vpow2.f32 %v751_v14 }
 0x202   : > { %2032 = vpow2.f32 %v761_v21 }
 0x203   : > { %2034 = vpow2.f32 %v755_v40 }
 0x204   : > { %1018 = vperm.xlu0 %2016, %v2687_v13   ;;  %787 = vperm.xlu1 %2017, %v713_v29   ;;  %2036 = vpow2.f32 %v765_v31 }
 0x205   : > { %2038 = vpow2.f32 %v759_v56 }
 0x206   : > { %v2694_v28 = vpop.eup %2020  ;;  %2040 = vpow2.f32 %v769_v49 }
 0x207   : > { %v2701_v16 = vpop.eup %2022  ;;  %2042 = vpow2.f32 %v763_v10 }
 0x208   : > { %792 = vperm.xlu1 %2017, %v714_v38   ;;  %1033 = vperm.xlu0 %2016, %v2694_v28   ;;  %v2703_v24 = vpop.eup %2024  ;;  %2044 = vpow2.f32 %v767_v57 }
 0x209   : > { %v2709_v0 = vpop.eup %2026 }
 0x20a   : > { %v2711_v25 = vpop.eup %2028 }
 0x20b   : > { %v2717_v29 = vpop.eup %2030 }
 0x20c   : > { %1023 = vperm.xlu1 %2017, %v2703_v24   ;;  %1043 = vperm.xlu0 %2016, %v2701_v16   ;;  %v2719_v33 = vpop.eup %2032 }
 0x20d   : > { %v2723_v2 = vpop.eup %2034 }
 0x20e   : > { %v2725_v34 = vpop.eup %2036 }
 0x20f   : > { %v2729_v18 = vpop.eup %2038 }
 0x210   : > { %1028 = vperm.xlu1 %2017, %v2711_v25   ;;  %1053 = vperm.xlu0 %2016, %v2709_v0   ;;  %v2731_v26 = vpop.eup %2040 }
 0x211   : > { %v2735_v32 = vpop.eup %2042 }
 0x212   : > { %v2738_v35 = vpop.eup %2044 }
 0x214   : > { %1038 = vperm.xlu1 %2017, %v2717_v29   ;;  %1063 = vperm.xlu0 %2016, %v2719_v33  }
 0x218   : > { %1048 = vperm.xlu1 %2017, %v2723_v2   ;;  %1073 = vperm.xlu0 %2016, %v2725_v34  }
 0x21c   : > { %1058 = vperm.xlu1 %2017, %v2729_v18   ;;  %1083 = vperm.xlu0 %2016, %v2731_v26  }
 0x220   : > { %1068 = vperm.xlu1 %2017, %v2735_v32  }
 0x224   : > { %1078 = vperm.xlu1 %2017, %v2738_v35  }
 0x25b   : > { %v803_v38 = vpop.permute.xlu1 %802 }
 0x25c   : > { %v860_v42 = vsub.f32 %v2502_v44, %v803_v38 }
 0x25e   : > { %v881_v53 = vmul.f32 1.442695, %v860_v42 }
 0x25f   : > { %v798_v45 = vpop.permute.xlu0 %797 }
 0x260   : > { %v859_v51 = vsub.f32 %v2505_v47, %v798_v45 }
 0x262   : > { %v879_v60 = vmul.f32 1.442695, %v859_v51 }
 0x263   : > { %v778_v62 = vpop.permute.xlu1 %777 }
 0x264   : > { %2046 = vpow2.f32 %v879_v60  ;;  %v855_v17 = vsub.f32 %v2513_v52, %v778_v62 }
 0x265   : > { %2048 = vpow2.f32 %v881_v53 }
 0x266   : > { %v871_v8 = vmul.f32 1.442695, %v855_v17 }
 0x267   : > { %v813_v9 = vpop.permute.xlu1 %812 }
 0x268   : > { %2050 = vpow2.f32 %v871_v8  ;;  %v862_v11 = vsub.f32 %v2507_v48, %v813_v9 }
 0x26a   : > { %v885_v27 = vmul.f32 1.442695, %v862_v11 }
 0x26b   : > { %v808_v12 = vpop.permute.xlu1 %807 }
 0x26c   : > { %v861_v22 = vsub.f32 %v2511_v50, %v808_v12 }
 0x26e   : > { %v2746_v44 = vpop.eup %2046  ;;  %v883_v14 = vmul.f32 1.442695, %v861_v22 }
 0x26f   : > { %v2748_v47 = vpop.eup %2048  ;;  %v823_v20 = vpop.permute.xlu1 %822  ;;  %1824 = vmatprep.mubr.f32.mxu1 %v2746_v44 }
 0x270   : > { %2052 = vpow2.f32 %v883_v14  ;;  %1825 = vmatmul.mubr.f32.vlgmr.msra.gmra.mrb[0].mxu1 %v2748_v47  ;;  %v864_v52 = vsub.f32 %v2515_v54, %v823_v20  ;;  %v843_v21 = vpop.permute.xlu0 %842 }
 0x271   : > { %2054 = vpow2.f32 %v885_v27 }
 0x272   : > { %v2051_v48 = vpop.eup %2050  ;;  %v889_v40 = vmul.f32 1.442695, %v864_v52 }
 0x273   : > { %1818 = vmatprep.mubr.f32.mxu0 %v2051_v48  ;;  %v818_v23 = vpop.permute.xlu1 %817  ;;  %935 = vadd.xlane.f32.xlu1 %v2051_v48 }
 0x274   : > { %v863_v50 = vsub.f32 %v2519_v55, %v818_v23  ;;  %v838_v31 = vpop.permute.xlu0 %837  ;;  %v868_v55 = vsub.f32 %v2529_v63, %v843_v21 }
 0x275   : > { %v867_v49 = vsub.f32 %v2535_v3, %v838_v31 }
 0x276   : > { %v887_v46 = vmul.f32 1.442695, %v863_v50  ;;  %v897_v3 = vmul.f32 1.442695, %v868_v55  ;;  %v771_v50 = vmul.f32 1.442695, %v741_v19 }
 0x277   : > { %v833_v36 = vpop.permute.xlu1 %832  ;;  %v895_v42 = vmul.f32 1.442695, %v867_v49 }
 0x278   : > { %2056 = vpow2.f32 %v887_v46  ;;  %v866_v56 = vsub.f32 %v2521_v58, %v833_v36 }
 0x279   : > { %2058 = vpow2.f32 %v889_v40 }
 0x27a   : > { %v2053_v41 = vpop.eup %2052  ;;  %v893_v38 = vmul.f32 1.442695, %v866_v56  ;;  %v903_v56 = vld [vmem:[#allocation3] sm:$0xff] }
 0x27b   : > { %v2055_v10 = vpop.eup %2054  ;;  %v828_v54 = vpop.permute.xlu1 %827  ;;  %1827 = vmatprep.mubr.f32.mxu1 %v2053_v41 }
 0x27c   : > { %v848_v15 = vpop.permute.xlu0 %847  ;;  %v865_v57 = vsub.f32 %v2525_v59, %v828_v54  ;;  %1828 = vmatmul.mubr.f32.gmra.mrb[2].mxu1 %v2055_v10 }
 0x27d   : > { %v869_v51 = vsub.f32 %v2547_v7, %v848_v15 }
 0x27e   : > { %v891_v45 = vmul.f32 1.442695, %v865_v57 }
 0x27f   : > { %v783_v53 = vpop.permute.xlu1 %782  ;;  %v899_v59 = vmul.f32 1.442695, %v869_v51 }
 0x280   : > { %v853_v60 = vpop.permute.xlu0 %852  ;;  %2060 = vpow2.f32 %v891_v45  ;;  %v856_v58 = vsub.f32 %v2531_v1, %v783_v53  ;;  %v905_v53 = vld [vmem:[#allocation3 + $0x10] sm:$0xff] }
 0x281   : > { %2062 = vpow2.f32 %v893_v38  ;;  %v870_v62 = vsub.f32 %v2541_v5, %v853_v60  ;;  %v921_v60 = vmul.f32 %v2711_v25, %v905_v53 }
 0x282   : > { %v2057_v17 = vpop.eup %2056  ;;  %2064 = vpow2.f32 %v895_v42  ;;  %v873_v8 = vmul.f32 1.442695, %v856_v58  ;;  %v904_v42 = vld [vmem:[#allocation3 + $0x8] sm:$0xff] }
 0x283   : > { %v2059_v9 = vpop.eup %2058  ;;  %v788_v63 = vpop.permute.xlu1 %787  ;;  %1830 = vmatprep.mubr.f32.mxu1 %v2057_v17  ;;  %v901_v7 = vmul.f32 1.442695, %v870_v62  ;;  %v920_v45 = vmul.f32 %v2703_v24, %v904_v42 }
 0x284   : > { %2066 = vpow2.f32 %v873_v8  ;;  %v857_v11 = vsub.f32 %v2537_v4, %v788_v63  ;;  %1831 = vmatmul.mubr.f32.gmra.mrb[4].mxu1 %v2059_v9  ;;  %v2787_v37 = vpop.permute.xlu0 %1018  ;;  %v908_v63 = vld [vmem:[#allocation3 + $0x28] sm:$0xff] }
 0x285   : > { %2068 = vpow2.f32 %v897_v3  ;;  %v906_v3 = vld [vmem:[#allocation3 + $0x18] sm:$0xff]  ;;  %v924_v25 = vmul.f32 %v2701_v16, %v908_v63  ;;  %v912_v16 = vld [vmem:[#allocation3 + $0x48] sm:$0xff] }
 0x286   : > { %2070 = vpow2.f32 %v899_v59  ;;  %v875_v12 = vmul.f32 1.442695, %v857_v11  ;;  %v922_v59 = vmul.f32 %v2694_v28, %v906_v3  ;;  %v1005_v63 = vld [vmem:[#allocation4 + $0x28] sm:$0xff] }
 0x287   : > { %v793_v1 = vpop.permute.xlu1 %792 }
 0x288   : > { %2072 = vpow2.f32 %v875_v12  ;;  %v858_v22 = vsub.f32 %v2543_v6, %v793_v1  ;;  %v2791_v19 = vpop.permute.xlu0 %1033 }
 0x289   : > { %2074 = vpow2.f32 %v901_v7  ;;  %v909_v7 = vld [vmem:[#allocation3 + $0x30] sm:$0xff] }
 0x28a   : > { %v2061_v5 = vpop.eup %2060  ;;  %v877_v27 = vmul.f32 1.442695, %v858_v22  ;;  %v925_v22 = vmul.f32 %v2723_v2, %v909_v7  ;;  %v928_v2 = vmul.f32 %v2719_v33, %v912_v16  ;;  %v916_v33 = vld [vmem:[#allocation3 + $0x68] sm:$0xff] }
 0x28b   : > { %v2063_v14 = vpop.eup %2062  ;;  %1833 = vmatprep.mubr.f32.mxu1 %v2061_v5  ;;  %v2777_v46 = vpop.permute.xlu1 %1023 }
 0x28c   : > { %v2065_v20 = vpop.eup %2064  ;;  %2076 = vpow2.f32 %v877_v27  ;;  %1834 = vmatmul.mubr.f32.gmra.mrb[6].mxu1 %v2063_v14  ;;  %v2796_v49 = vpop.permute.xlu0 %1043 }
 0x28d   : > { %1836 = vmatprep.mubr.f32.mxu1 %v2065_v20  ;;  %2078 = vpow2.f32 %v771_v50 }
 0x28e   : > { %v2067_v52 = vpop.eup %2066 }
 0x28f   : > { %v2069_v4 = vpop.eup %2068  ;;  %1819 = vmatmul.mubr.f32.vlgmr.msra.gmra.mrb[16].mxu0 %v2067_v52  ;;  %937 = vadd.xlane.f32.xlu0 %v2067_v52  ;;  %v2779_v31 = vpop.permute.xlu1 %1028 }
 0x290   : > { %v2071_v21 = vpop.eup %2070  ;;  %1837 = vmatmul.mubr.f32.gmra.mrb[8].mxu1 %v2069_v4  ;;  %v2799_v15 = vpop.permute.xlu0 %1053 }
 0x291   : > { %1839 = vmatprep.mubr.f32.mxu1 %v2071_v21 }
 0x292   : > { %v2073_v48 = vpop.eup %2072 }
 0x293   : > { %v2075_v23 = vpop.eup %2074  ;;  %1821 = vmatprep.mubr.f32.mxu0 %v2073_v48  ;;  %939 = vadd.xlane.f32.xlu0 %v2073_v48  ;;  %v2781_v39 = vpop.permute.xlu1 %1038 }
 0x294   : > { %1840 = vmatmul.mubr.f32.gmra.mrb[10].mxu1 %v2075_v23  ;;  %v2801_v57 = vpop.permute.xlu0 %1063 }
 0x296   : > { %v2077_v6 = vpop.eup %2076 }
 0x297   : > { %941 = vadd.xlane.f32.xlu1 %v2077_v6  ;;  %1822 = vmatmul.mubr.f32.gmra.mrb[18].mxu0 %v2077_v6  ;;  %v2783_v61 = vpop.permute.xlu1 %1048 }
 0x298   : > { %943 = vadd.xlane.f32.xlu0 %v2746_v44  ;;  %v773_v44 = vmul.f32 1.442695, %v742_v43  ;;  %v2803_v55 = vpop.permute.xlu0 %1073 }
 0x29a   : > { %2080 = vpow2.f32 %v773_v44 }
 0x29b   : > { %945 = vadd.xlane.f32.xlu1 %v2748_v47  ;;  %v2771_v47 = vpop.eup %2078  ;;  %v2785_v30 = vpop.permute.xlu1 %1058 }
 0x29c   : > { %947 = vadd.xlane.f32.xlu0 %v2053_v41  ;;  %v919_v41 = vmul.f32 %v2687_v13, %v903_v56  ;;  %v2805_v38 = vpop.permute.xlu0 %1083 }
 0x29f   : > { %949 = vadd.xlane.f32.xlu1 %v2055_v10  ;;  %v2789_v43 = vpop.permute.xlu1 %1068 }
 0x2a0   : > { %951 = vadd.xlane.f32.xlu0 %v2057_v17  ;;  %v907_v17 = vld [vmem:[#allocation3 + $0x20] sm:$0xff] }
 0x2a3   : > { %953 = vadd.xlane.f32.xlu1 %v2059_v9  ;;  %v2793_v36 = vpop.permute.xlu1 %1078  ;;  %v923_v9 = vmul.f32 %v2717_v29, %v907_v17 }
 0x2a4   : > { %955 = vadd.xlane.f32.xlu0 %v2061_v5  ;;  %v2774_v40 = vpop.eup %2080  ;;  %v910_v5 = vld [vmem:[#allocation3 + $0x38] sm:$0xff] }
 0x2a5   : > { %v926_v29 = vmul.f32 %v2709_v0, %v910_v5  ;;  %v914_v0 = vld [vmem:[#allocation3 + $0x58] sm:$0xff] }
 0x2a7   : > { %957 = vadd.xlane.f32.xlu1 %v2063_v14  ;;  %v911_v14 = vld [vmem:[#allocation3 + $0x40] sm:$0xff] }
 0x2a8   : > { %959 = vadd.xlane.f32.xlu0 %v2065_v20 }
 0x2ab   : > { %961 = vadd.xlane.f32.xlu1 %v2069_v4  ;;  %v927_v4 = vmul.f32 %v2729_v18, %v911_v14  ;;  %v930_v18 = vmul.f32 %v2725_v34, %v914_v0  ;;  %v918_v34 = vld [vmem:[#allocation3 + $0x78] sm:$0xff] }
 0x2ac   : > { %963 = vadd.xlane.f32.xlu0 %v2071_v21 }
 0x2af   : > { %965 = vadd.xlane.f32.xlu1 %v2075_v23  ;;  %v913_v23 = vld [vmem:[#allocation3 + $0x50] sm:$0xff] }
 0x2b0   : > { %v929_v44 = vmul.f32 %v2735_v32, %v913_v23  ;;  %v932_v32 = vmul.f32 %v2731_v26, %v916_v33  ;;  %v1004_v26 = vld [vmem:[#allocation4 + $0x20] sm:$0xff]  ;;  %v1001_v23 = vld [vmem:[#allocation4 + $0x8] sm:$0xff]  ;;  %v1015_v33 = vld [vmem:[#allocation4 + $0x78] sm:$0xff] }
 0x2c0   : > { %1088 = vperm.xlu1 %2017, %v2771_v47  }
 0x2c2   : > { %1093 = vperm.xlu0 %2016, %v2774_v40  }
 0x300   : > { %v936_v10 = vpop.xlane.xlu1 %935 }
 0x301   : > { %v967_v54 = vadd.f32 %v936_v10, %v919_v41  ;;  %v915_v10 = vld [vmem:[#allocation3 + $0x60] sm:$0xff] }
 0x303   : > { %984 = vst.msk [vmem:[#allocation3] sm:$0xff] %vm983_vm2, %v967_v54 }
 0x31c   : > { %v938_v51 = vpop.xlane.xlu0 %937 }
 0x31d   : > { %v968_v13 = vadd.f32 %v938_v51, %v920_v45  ;;  %v931_v45 = vmul.f32 %v2738_v35, %v915_v10  ;;  %v934_v35 = vmul.f32 %v2774_v40, %v918_v34  ;;  %v1006_v40 = vld [vmem:[#allocation4 + $0x30] sm:$0xff] }
 0x31e   : > { %v1102_v5 = vmul.f32 %v2783_v61, %v1006_v40  ;;  %v1010_v61 = vld [vmem:[#allocation4 + $0x50] sm:$0xff] }
 0x31f   : > { %985 = vst.msk [vmem:[#allocation3 + $0x8] sm:$0xff] %vm983_vm2, %v968_v13  ;;  %v917_v13 = vld [vmem:[#allocation3 + $0x70] sm:$0xff] }
 0x320   : > { %v940_v58 = vpop.xlane.xlu0 %939  ;;  %v933_v3 = vmul.f32 %v2771_v47, %v917_v13  ;;  %v1100_v47 = vmul.f32 %v2781_v39, %v1004_v26  ;;  %v1008_v39 = vld [vmem:[#allocation4 + $0x40] sm:$0xff]  ;;  %v1014_v13 = vld [vmem:[#allocation4 + $0x70] sm:$0xff] }
 0x321   : > { %v969_v62 = vadd.f32 %v940_v58, %v921_v60 }
 0x323   : > { %986 = vst.msk [vmem:[#allocation3 + $0x10] sm:$0xff] %vm983_vm2, %v969_v62 }
 0x324   : > { %v942_v8 = vpop.xlane.xlu1 %941 }
 0x325   : > { %v970_v24 = vadd.f32 %v942_v8, %v922_v59  ;;  %v944_v11 = vpop.xlane.xlu0 %943 }
 0x326   : > { %v971_v12 = vadd.f32 %v944_v11, %v923_v9 }
 0x327   : > { %987 = vst.msk [vmem:[#allocation3 + $0x18] sm:$0xff] %vm983_vm2, %v970_v24  ;;  %v1101_v24 = vmul.f32 %v2796_v49, %v1005_v63  ;;  %v1009_v49 = vld [vmem:[#allocation4 + $0x48] sm:$0xff] }
 0x328   : > { %988 = vst.msk [vmem:[#allocation3 + $0x20] sm:$0xff] %vm983_vm2, %v971_v12  ;;  %v946_v1 = vpop.xlane.xlu1 %945 }
 0x329   : > { %v972_v27 = vadd.f32 %v946_v1, %v924_v25  ;;  %v948_v28 = vpop.xlane.xlu0 %947  ;;  %v1007_v1 = vld [vmem:[#allocation4 + $0x38] sm:$0xff] }
 0x32a   : > { %v973_v20 = vadd.f32 %v948_v28, %v925_v22  ;;  %v1103_v22 = vmul.f32 %v2799_v15, %v1007_v1  ;;  %v1011_v15 = vld [vmem:[#allocation4 + $0x58] sm:$0xff] }
 0x32b   : > { %989 = vst.msk [vmem:[#allocation3 + $0x28] sm:$0xff] %vm983_vm2, %v972_v27 }
 0x32c   : > { %990 = vst.msk [vmem:[#allocation3 + $0x30] sm:$0xff] %vm983_vm2, %v973_v20  ;;  %v950_v52 = vpop.xlane.xlu1 %949 }
 0x32d   : > { %v974_v21 = vadd.f32 %v950_v52, %v926_v29  ;;  %v952_v48 = vpop.xlane.xlu0 %951  ;;  %v1105_v29 = vmul.f32 %v2801_v57, %v1009_v49  ;;  %v1104_v52 = vmul.f32 %v2785_v30, %v1008_v39  ;;  %v1097_v30 = vmul.f32 %v2777_v46, %v1001_v23 }
 0x32e   : > { %v975_v6 = vadd.f32 %v952_v48, %v927_v4 }
 0x32f   : > { %991 = vst.msk [vmem:[#allocation3 + $0x38] sm:$0xff] %vm983_vm2, %v974_v21  ;;  %v1313_v1 = vld [vmem:[#allocation3 + $0x20] sm:$0xff] (!%p1684_p10) }
 0x330   : > { %992 = vst.msk [vmem:[#allocation3 + $0x40] sm:$0xff] %vm983_vm2, %v975_v6  ;;  %v954_v50 = vpop.xlane.xlu1 %953  ;;  %v1107_v6 = vmul.f32 %v2803_v55, %v1011_v15 }
 0x331   : > { %v976_v56 = vadd.f32 %v954_v50, %v928_v2  ;;  %v956_v41 = vpop.xlane.xlu0 %955  ;;  %v1000_v2 = vld [vmem:[#allocation4] sm:$0xff]  ;;  %v1013_v50 = vld [vmem:[#allocation4 + $0x68] sm:$0xff] }
 0x332   : > { %v977_v54 = vadd.f32 %v956_v41, %v929_v44  ;;  %v1106_v44 = vmul.f32 %v2789_v43, %v1010_v61 }
 0x333   : > { %993 = vst.msk [vmem:[#allocation3 + $0x48] sm:$0xff] %vm983_vm2, %v976_v56  ;;  %v1012_v56 = vld [vmem:[#allocation4 + $0x60] sm:$0xff] }
 0x334   : > { %994 = vst.msk [vmem:[#allocation3 + $0x50] sm:$0xff] %vm983_vm2, %v977_v54  ;;  %v958_v42 = vpop.xlane.xlu1 %957  ;;  %v1096_v54 = vmul.f32 %v2787_v37, %v1000_v2  ;;  %v1108_v55 = vmul.f32 %v2793_v36, %v1012_v56  ;;  %v1003_v37 = vld [vmem:[#allocation4 + $0x18] sm:$0xff] }
 0x335   : > { %v978_v51 = vadd.f32 %v958_v42, %v930_v18  ;;  %v960_v53 = vpop.xlane.xlu0 %959  ;;  %v1109_v18 = vmul.f32 %v2805_v38, %v1013_v50  ;;  %v1002_v38 = vld [vmem:[#allocation4 + $0x10] sm:$0xff] }
 0x336   : > { %v979_v60 = vadd.f32 %v960_v53, %v931_v45  ;;  %v1316_v40 = vld [vmem:[#allocation3 + $0x38] sm:$0xff] (!%p1684_p10) }
 0x337   : > { %995 = vst.msk [vmem:[#allocation3 + $0x58] sm:$0xff] %vm983_vm2, %v978_v51 }
 0x338   : > { %996 = vst.msk [vmem:[#allocation3 + $0x60] sm:$0xff] %vm983_vm2, %v979_v60  ;;  %v962_v58 = vpop.xlane.xlu1 %961 }
 0x339   : > { %v980_v62 = vadd.f32 %v962_v58, %v932_v32  ;;  %v964_v17 = vpop.xlane.xlu0 %963 }
 0x33a   : > { %v981_v59 = vadd.f32 %v964_v17, %v933_v3 }
 0x33b   : > { %997 = vst.msk [vmem:[#allocation3 + $0x68] sm:$0xff] %vm983_vm2, %v980_v62 }
 0x33c   : > { %998 = vst.msk [vmem:[#allocation3 + $0x70] sm:$0xff] %vm983_vm2, %v981_v59  ;;  %v966_v8 = vpop.xlane.xlu1 %965 }
 0x33d   : > { %v982_v9 = vadd.f32 %v966_v8, %v934_v35  ;;  %v1099_v35 = vmul.f32 %v2791_v19, %v1003_v37  ;;  %v1310_v19 = vld [vmem:[#allocation3 + $0x8] sm:$0xff] (!%p1684_p10) }
 0x33e   : > { %v1320_v39 = vld [vmem:[#allocation3 + $0x58] sm:$0xff] (!%p1684_p10) }
 0x33f   : > { %999 = vst.msk [vmem:[#allocation3 + $0x78] sm:$0xff] %vm983_vm2, %v982_v9  ;;  %v1098_v9 = vmul.f32 %v2779_v31, %v1002_v38  ;;  %v1314_v31 = vld [vmem:[#allocation3 + $0x28] sm:$0xff] (!%p1684_p10) }
 0x340   : > { %v1089_v60 = vpop.permute.xlu1 %1088 }
 0x341   : > { %v1094_v42 = vpop.permute.xlu0 %1093  ;;  %v1110_v62 = vmul.f32 %v1089_v60, %v1014_v13 }
 0x342   : > { %v1111_v34 = vmul.f32 %v1094_v42, %v1015_v33 }
 0x343   : > { %v1826_v11 = vpop.f32.mrb[0].mxu1 }
 0x344   : > { %v1262_v7 = vadd.f32 %v1826_v11, %v1101_v24  ;;  %v1198_v12 = vpop.f32.mrb[1].mxu1  ;;  %v1311_v11 = vld [vmem:[#allocation3 + $0x10] sm:$0xff] (!%p1684_p10) }
 0x345   : > { %v1261_v25 = vadd.f32 %v1198_v12, %v1100_v47  ;;  %v1312_v12 = vld [vmem:[#allocation3 + $0x18] sm:$0xff] (!%p1684_p10)  ;;  %2084 = vrcp.f32 (!%p1684_p10), %v1311_v11 }
 0x346   : > { %1278 = vst [vmem:[#allocation4 + $0x28] sm:$0xff] %v1262_v7  ;;  %v1309_v7 = vld [vmem:[#allocation3] sm:$0xff] (!%p1684_p10)  ;;  %v1324_v61 = vld [vmem:[#allocation3 + $0x78] sm:$0xff] (!%p1684_p10) }
 0x347   : > { %1277 = vst [vmem:[#allocation4 + $0x20] sm:$0xff] %v1261_v25  ;;  %v2247_v25 = vmov (!%p1684_p10), 0   ;;  %2086 = vrcp.f32 (!%p1684_p10), %v1309_v7 }
 0x348   : > { %2083 = vset.pattern.permute.xlu1 (!%p1684_p10), %v2247_v25  ;;  %2082 = vset.pattern.permute.xlu0 (!%p1684_p10), %v2247_v25  ;;  %2088 = vrcp.f32 (!%p1684_p10), %v1312_v12 }
 0x349   : > { %2090 = vrcp.f32 (!%p1684_p10), %v1310_v19 }
 0x34a   : > { %2092 = vrcp.f32 (!%p1684_p10), %v1314_v31 }
 0x34b   : > { %2094 = vrcp.f32 (!%p1684_p10), %v1313_v1 }
 0x34c   : > { %2096 = vrcp.f32 (!%p1684_p10), %v1316_v40 }
 0x34e   : > { %v1345_v60 = vld [vmem:[#allocation4 + $0x20] sm:$0xff] (!%p1684_p10) }
 0x34f   : > { %v1829_v27 = vpop.f32.mrb[2].mxu1 }
 0x350   : > { %v1264_v28 = vadd.f32 %v1829_v27, %v1103_v22  ;;  %v1208_v14 = vpop.f32.mrb[3].mxu1  ;;  %v1315_v22 = vld [vmem:[#allocation3 + $0x30] sm:$0xff] (!%p1684_p10) }
 0x351   : > { %v1263_v20 = vadd.f32 %v1208_v14, %v1102_v5  ;;  %v2085_v5 = vpop.eup (!%p1684_p10), %2084  ;;  %2098 = vrcp.f32 (!%p1684_p10), %v1315_v22 }
 0x352   : > { %1280 = vst [vmem:[#allocation4 + $0x38] sm:$0xff] %v1264_v28  ;;  %v2087_v27 = vpop.eup (!%p1684_p10), %2086  ;;  %1369 = vperm.xlu1 (!%p1684_p10), %2083, %v2085_v5   ;;  %v1318_v28 = vld [vmem:[#allocation3 + $0x48] sm:$0xff] (!%p1684_p10) }
 0x353   : > { %1279 = vst [vmem:[#allocation4 + $0x30] sm:$0xff] %v1263_v20  ;;  %v2089_v14 = vpop.eup (!%p1684_p10), %2088  ;;  %1359 = vperm.xlu0 (!%p1684_p10), %2082, %v2087_v27   ;;  %v1317_v20 = vld [vmem:[#allocation3 + $0x40] sm:$0xff] (!%p1684_p10)  ;;  %2100 = vrcp.f32 (!%p1684_p10), %v1318_v28 }
 0x354   : > { %v2091_v49 = vpop.eup (!%p1684_p10), %2090  ;;  %2102 = vrcp.f32 (!%p1684_p10), %v1317_v20 }
 0x355   : > { %2104 = vrcp.f32 (!%p1684_p10), %v1320_v39 }
 0x356   : > { %1374 = vperm.xlu1 (!%p1684_p10), %2083, %v2089_v14  }
 0x357   : > { %v1832_v4 = vpop.f32.mrb[4].mxu1  ;;  %1364 = vperm.xlu0 (!%p1684_p10), %2082, %v2091_v49  }
 0x358   : > { %v1266_v16 = vadd.f32 %v1832_v4, %v1105_v29  ;;  %v1218_v21 = vpop.f32.mrb[5].mxu1  ;;  %v2093_v29 = vpop.eup (!%p1684_p10), %2092 }
 0x359   : > { %v1265_v48 = vadd.f32 %v1218_v21, %v1104_v52  ;;  %v1319_v52 = vld [vmem:[#allocation3 + $0x50] sm:$0xff] (!%p1684_p10)  ;;  %v2095_v4 = vpop.eup (!%p1684_p10), %2094 }
 0x35a   : > { %1282 = vst [vmem:[#allocation4 + $0x48] sm:$0xff] %v1266_v16  ;;  %1384 = vperm.xlu1 (!%p1684_p10), %2083, %v2093_v29   ;;  %2106 = vrcp.f32 (!%p1684_p10), %v1319_v52  ;;  %v1322_v16 = vld [vmem:[#allocation3 + $0x68] sm:$0xff] (!%p1684_p10)  ;;  %v2097_v21 = vpop.eup (!%p1684_p10), %2096 }
 0x35b   : > { %1281 = vst [vmem:[#allocation4 + $0x40] sm:$0xff] %v1265_v48  ;;  %1379 = vperm.xlu0 (!%p1684_p10), %2082, %v2095_v4   ;;  %v1321_v48 = vld [vmem:[#allocation3 + $0x60] sm:$0xff] (!%p1684_p10)  ;;  %v2099_v15 = vpop.eup (!%p1684_p10), %2098  ;;  %2108 = vrcp.f32 (!%p1684_p10), %v1322_v16 }
 0x35c   : > { %2110 = vrcp.f32 (!%p1684_p10), %v1321_v48 }
 0x35d   : > { %v2101_v23 = vpop.eup (!%p1684_p10), %2100  ;;  %2112 = vrcp.f32 (!%p1684_p10), %v1324_v61 }
 0x35e   : > { %1394 = vperm.xlu1 (!%p1684_p10), %2083, %v2097_v21   ;;  %v2103_v2 = vpop.eup (!%p1684_p10), %2102 }
 0x35f   : > { %v1835_v0 = vpop.f32.mrb[6].mxu1  ;;  %1389 = vperm.xlu0 (!%p1684_p10), %2082, %v2099_v15   ;;  %v2105_v50 = vpop.eup (!%p1684_p10), %2104 }
 0x360   : > { %v1268_v57 = vadd.f32 %v1835_v0, %v1107_v6  ;;  %v1228_v41 = vpop.f32.mrb[7].mxu1  ;;  %v1323_v6 = vld [vmem:[#allocation3 + $0x70] sm:$0xff] (!%p1684_p10) }
 0x361   : > { %v1267_v10 = vadd.f32 %v1228_v41, %v1106_v44  ;;  %2114 = vrcp.f32 (!%p1684_p10), %v1323_v6 }
 0x362   : > { %1284 = vst [vmem:[#allocation4 + $0x58] sm:$0xff] %v1268_v57  ;;  %v1820_v45 = vpop.f32.mrb[16].mxu0  ;;  %1404 = vperm.xlu1 (!%p1684_p10), %2083, %v2101_v23  }
 0x363   : > { %1283 = vst [vmem:[#allocation4 + $0x50] sm:$0xff] %v1267_v10  ;;  %v1258_v51 = vadd.f32 %v1820_v45, %v1097_v30  ;;  %v1178_v43 = vpop.f32.mrb[17].mxu0  ;;  %v1838_v53 = vpop.f32.mrb[8].mxu1  ;;  %1399 = vperm.xlu0 (!%p1684_p10), %2082, %v2103_v2  }
 0x364   : > { %v1257_v32 = vadd.f32 %v1178_v43, %v1096_v54  ;;  %v1270_v58 = vadd.f32 %v1838_v53, %v1109_v18  ;;  %v1238_v46 = vpop.f32.mrb[9].mxu1  ;;  %v2107_v44 = vpop.eup (!%p1684_p10), %2106 }
 0x365   : > { %1274 = vst [vmem:[#allocation4 + $0x8] sm:$0xff] %v1258_v51  ;;  %v1269_v3 = vadd.f32 %v1238_v46, %v1108_v55  ;;  %v2109_v0 = vpop.eup (!%p1684_p10), %2108  ;;  %v1346_v46 = vld [vmem:[#allocation4 + $0x28] sm:$0xff] (!%p1684_p10) }
 0x366   : > { %1273 = vst [vmem:[#allocation4] sm:$0xff] %v1257_v32  ;;  %1286 = vst [vmem:[#allocation4 + $0x68] sm:$0xff] %v1270_v58  ;;  %1414 = vperm.xlu1 (!%p1684_p10), %2083, %v2105_v50   ;;  %v2111_v56 = vpop.eup (!%p1684_p10), %2110 }
 0x367   : > { %1285 = vst [vmem:[#allocation4 + $0x60] sm:$0xff] %v1269_v3  ;;  %v1841_v36 = vpop.f32.mrb[10].mxu1  ;;  %1409 = vperm.xlu0 (!%p1684_p10), %2082, %v2107_v44   ;;  %v2113_v57 = vpop.eup (!%p1684_p10), %2112 }
 0x368   : > { %v1272_v17 = vadd.f32 %v1841_v36, %v1111_v34  ;;  %v1248_v59 = vpop.f32.mrb[11].mxu1  ;;  %1308 = sbr.rel (%p1684_p10) target bundleno = 1171 (0x493), region = 82  ;;  %v1347_v34 = vld [vmem:[#allocation4 + $0x30] sm:$0xff] (!%p1684_p10)  ;;  %v1348_v36 = vld [vmem:[#allocation4 + $0x38] sm:$0xff] (!%p1684_p10) }
 0x369   : > { %v1271_v8 = vadd.f32 %v1248_v59, %v1110_v62  ;;  %v1352_v12 = vld [vmem:[#allocation4 + $0x58] sm:$0xff] (!%p1684_p10) }
 0x36a   : > { %1288 = vst [vmem:[#allocation4 + $0x78] sm:$0xff] %v1272_v17  ;;  %v1823_v63 = vpop.f32.mrb[18].mxu0  ;;  %1424 = vperm.xlu1 (!%p1684_p10), %2083, %v2109_v0  }
 0x36b   : > { %1287 = vst [vmem:[#allocation4 + $0x70] sm:$0xff] %v1271_v8  ;;  %v1260_v26 = vadd.f32 %v1823_v63, %v1099_v35  ;;  %v1188_v24 = vpop.f32.mrb[19].mxu0  ;;  %1419 = vperm.xlu0 (!%p1684_p10), %2082, %v2111_v56   ;;  %v2115_v41 = vpop.eup (!%p1684_p10), %2114  ;;  %v1349_v35 = vld [vmem:[#allocation4 + $0x40] sm:$0xff] (!%p1684_p10)  ;;  %v1350_v63 = vld [vmem:[#allocation4 + $0x48] sm:$0xff] (!%p1684_p10) }
 0x36c   : > { %v1259_v47 = vadd.f32 %v1188_v24, %v1098_v9  ;;  %v1342_v18 = vld [vmem:[#allocation4 + $0x8] sm:$0xff] (!%p1684_p10) }
 0x36d   : > { %1276 = vst [vmem:[#allocation4 + $0x18] sm:$0xff] %v1260_v26  ;;  %v1341_v30 = vld [vmem:[#allocation4] sm:$0xff] (!%p1684_p10)  ;;  %v1354_v22 = vld [vmem:[#allocation4 + $0x68] sm:$0xff] (!%p1684_p10) }
 0x36e   : > { %1275 = vst [vmem:[#allocation4 + $0x10] sm:$0xff] %v1259_v47  ;;  %1434 = vperm.xlu1 (!%p1684_p10), %2083, %v2113_v57   ;;  %v1351_v47 = vld [vmem:[#allocation4 + $0x50] sm:$0xff] (!%p1684_p10)  ;;  %v1353_v31 = vld [vmem:[#allocation4 + $0x60] sm:$0xff] (!%p1684_p10) }
 0x36f   : > { %1429 = vperm.xlu0 %2082, %v2115_v41  }
 0x371   : > { %v1356_v49 = vld [vmem:[#allocation4 + $0x78] sm:$0xff] }
 0x372   : > { %v1355_v28 = vld [vmem:[#allocation4 + $0x70] sm:$0xff] }
 0x374   : > { %v1344_v43 = vld [vmem:[#allocation4 + $0x18] sm:$0xff] }
 0x375   : > { %v1343_v42 = vld [vmem:[#allocation4 + $0x10] sm:$0xff] }
 0x3d1   : > { %v1370_v33 = vpop.permute.xlu1 %1369 }
 0x3d2   : > { %v1360_v10 = vpop.permute.xlu0 %1359  ;;  %v1439_v51 = vmul.f32 %v1370_v33, %v1343_v42 }
 0x3d3   : > { %v1437_v54 = vmul.f32 %v1360_v10, %v1341_v30 }
 0x3d5   : > { %1453 = vxpose.xlu0.b32.start [1/16] %v1437_v54, 128  ;;  %v1375_v53 = vpop.permute.xlu1 %1374 }
 0x3d6   : > { %v1365_v45 = vpop.permute.xlu0 %1364  ;;  %v1440_v13 = vmul.f32 %v1375_v53, %v1344_v43 }
 0x3d7   : > { %v1438_v55 = vmul.f32 %v1365_v45, %v1342_v18 }
 0x3d9   : > { %1454 = vxpose.xlu0.b32.cont [2/16] %v1438_v55, 128  ;;  %v1385_v3 = vpop.permute.xlu1 %1384 }
 0x3da   : > { %v1380_v32 = vpop.permute.xlu0 %1379  ;;  %v1442_v37 = vmul.f32 %v1385_v3, %v1346_v46 }
 0x3db   : > { %v1441_v58 = vmul.f32 %v1380_v32, %v1345_v60 }
 0x3dd   : > { %1455 = vxpose.xlu0.b32.cont [3/16] %v1439_v51, 128  ;;  %v1395_v17 = vpop.permute.xlu1 %1394 }
 0x3de   : > { %v1390_v38 = vpop.permute.xlu0 %1389  ;;  %v1444_v59 = vmul.f32 %v1395_v17, %v1348_v36 }
 0x3df   : > { %v1443_v62 = vmul.f32 %v1390_v38, %v1347_v34 }
 0x3e1   : > { %1456 = vxpose.xlu0.b32.cont [4/16] %v1440_v13, 128  ;;  %v1405_v26 = vpop.permute.xlu1 %1404 }
 0x3e2   : > { %v1400_v8 = vpop.permute.xlu0 %1399  ;;  %v1446_v24 = vmul.f32 %v1405_v26, %v1350_v63 }
 0x3e3   : > { %v1445_v9 = vmul.f32 %v1400_v8, %v1349_v35 }
 0x3e5   : > { %1457 = vxpose.xlu0.b32.cont [5/16] %v1441_v58, 128  ;;  %v1415_v25 = vpop.permute.xlu1 %1414 }
 0x3e6   : > { %v1410_v11 = vpop.permute.xlu0 %1409  ;;  %v1448_v19 = vmul.f32 %v1415_v25, %v1352_v12 }
 0x3e7   : > { %v1447_v7 = vmul.f32 %v1410_v11, %v1351_v47 }
 0x3e9   : > { %1458 = vxpose.xlu0.b32.cont [6/16] %v1442_v37, 128  ;;  %v1425_v5 = vpop.permute.xlu1 %1424 }
 0x3ea   : > { %v1420_v1 = vpop.permute.xlu0 %1419  ;;  %v1450_v27 = vmul.f32 %v1425_v5, %v1354_v22 }
 0x3eb   : > { %v1449_v40 = vmul.f32 %v1420_v1, %v1353_v31 }
 0x3ed   : > { %1459 = vxpose.xlu0.b32.cont [7/16] %v1443_v62, 128  ;;  %v1435_v39 = vpop.permute.xlu1 %1434 }
 0x3ee   : > { %v1430_v14 = vpop.permute.xlu0 %1429  ;;  %v1452_v29 = vmul.f32 %v1435_v39, %v1356_v49 }
 0x3ef   : > { %v1451_v20 = vmul.f32 %v1430_v14, %v1355_v28 }
 0x3f1   : > { %1460 = vxpose.xlu0.b32.cont [8/16] %v1444_v59, 128 }
 0x3f5   : > { %1461 = vxpose.xlu0.b32.cont [9/16] %v1445_v9, 128 }
 0x3f9   : > { %1462 = vxpose.xlu0.b32.cont [10/16] %v1446_v24, 128 }
 0x3fd   : > { %1463 = vxpose.xlu0.b32.cont [11/16] %v1447_v7, 128 }
 0x401   : > { %1464 = vxpose.xlu0.b32.cont [12/16] %v1448_v19, 128 }
 0x405   : > { %1465 = vxpose.xlu0.b32.cont [13/16] %v1449_v40, 128 }
 0x409   : > { %1466 = vxpose.xlu0.b32.cont [14/16] %v1450_v27, 128 }
 0x40d   : > { %1467 = vxpose.xlu0.b32.cont [15/16] %v1451_v20, 128 }
 0x411   : > { %1468 = vxpose.xlu0.b32.end [16/16] %v1452_v29, 128 }
 0x455   : > { %v1469_v52 = vpop.trf.xlu0 }
 0x456   : > { %1485 = vst [vmem:[%s2422_s1] sm:$0xff] %v1469_v52 }
 0x459   : > { %v1470_v4 = vpop.trf.xlu0 }
 0x45a   : > { %1486 = vst [vmem:[%s2422_s1 + $0x8] sm:$0xff] %v1470_v4 }
 0x45d   : > { %v1471_v16 = vpop.trf.xlu0 }
 0x45e   : > { %1487 = vst [vmem:[%s2422_s1 + $0x10] sm:$0xff] %v1471_v16 }
 0x461   : > { %v1472_v21 = vpop.trf.xlu0 }
 0x462   : > { %1488 = vst [vmem:[%s2422_s1 + $0x18] sm:$0xff] %v1472_v21 }
 0x465   : > { %v1473_v48 = vpop.trf.xlu0 }
 0x466   : > { %1489 = vst [vmem:[%s2422_s1 + $0x20] sm:$0xff] %v1473_v48 }
 0x469   : > { %v1474_v15 = vpop.trf.xlu0 }
 0x46a   : > { %1490 = vst [vmem:[%s2422_s1 + $0x28] sm:$0xff] %v1474_v15 }
 0x46d   : > { %v1475_v61 = vpop.trf.xlu0 }
 0x46e   : > { %1491 = vst [vmem:[%s2422_s1 + $0x30] sm:$0xff] %v1475_v61 }
 0x471   : > { %v1476_v23 = vpop.trf.xlu0 }
 0x472   : > { %1492 = vst [vmem:[%s2422_s1 + $0x38] sm:$0xff] %v1476_v23 }
 0x475   : > { %v1477_v6 = vpop.trf.xlu0 }
 0x476   : > { %1493 = vst [vmem:[%s2422_s1 + $0x40] sm:$0xff] %v1477_v6 }
 0x479   : > { %v1478_v2 = vpop.trf.xlu0 }
 0x47a   : > { %1494 = vst [vmem:[%s2422_s1 + $0x48] sm:$0xff] %v1478_v2 }
 0x47d   : > { %v1479_v50 = vpop.trf.xlu0 }
 0x47e   : > { %1495 = vst [vmem:[%s2422_s1 + $0x50] sm:$0xff] %v1479_v50 }
 0x481   : > { %v1480_v44 = vpop.trf.xlu0 }
 0x482   : > { %1496 = vst [vmem:[%s2422_s1 + $0x58] sm:$0xff] %v1480_v44 }
 0x485   : > { %v1481_v0 = vpop.trf.xlu0 }
 0x486   : > { %1497 = vst [vmem:[%s2422_s1 + $0x60] sm:$0xff] %v1481_v0 }
 0x489   : > { %v1482_v56 = vpop.trf.xlu0 }
 0x48a   : > { %1498 = vst [vmem:[%s2422_s1 + $0x68] sm:$0xff] %v1482_v56 }
 0x48d   : > { %v1483_v57 = vpop.trf.xlu0 }
 0x48e   : > { %1499 = vst [vmem:[%s2422_s1 + $0x70] sm:$0xff] %v1483_v57 }
 0x491   : > { %v1484_v41 = vpop.trf.xlu0 }
 0x492   : > { %1500 = vst [vmem:[%s2422_s1 + $0x78] sm:$0xff] %v1484_v41 }
 0x493 PF: > { %s1686_s19 = sshll.u32 %s2226_s22, 5  ;;  %s1516_s28 = sshll.u32 %s2422_s1, 4  ;;  %s2871_s28 = int_to_ptr.vmem [resolvable:$true] %s1516_s28 }
 0x494   : > { %s1513_s20 = sadd.s32 %s2222_s21, %s1686_s19  ;;  %s2971_s6 = sand.u32 1, %s2202_s16  }
 0x495   : > { %s1687_s27 = sshll.u32 %s1513_s20, 7  ;;  %s2880_s12 = scalar_lea.sflag [#allocation7], %s2971_s6 }
 0x496   : > { %s2876_s14 = scalar_lea.hbm %s2948_s4, %s1687_s27  ;;  %s2116_s10 = scalar_lea.vmem %s2871_s28, 2048 }
 0x497   : > { %p2117_p12 = scmp.ne.s32.totalorder %s2871_s28, %s2116_s10  ;;  %s2248_s21 = smov [#allocation6]  }
 0x498   : > { %s2120_s22 = sshll.u32 %s2248_s21, 4  ;;  %s2121_s22 = int_to_ptr.vmem [resolvable:$false] %s2120_s22 }
 0x499   : > { %p2118_p13 = pnand %p2117_p12, %p2363_p9  ;;  %s2122_s13 = scalar_lea.vmem %s2121_s22, 4096 }
 0x49a   : > { %p2123_p1 = scmp.lt.s32.totalorder %s2871_s28, %s2121_s22  ;;  %p2124_p2 = scmp.lt.s32.totalorder %s2122_s13, %s2116_s10 }
 0x49b   : > { %p2119_p0 = pneg %p2118_p13 }
 0x49c   : > { %p2125_p3 = por %p2124_p2, %p2123_p1 }
 0x49e   : > { %p2126_p4 = pnand %p2125_p3, %p2119_p0 }
 0x4a0   : > { %2129 = shalt.err (!%p2126_p4)
}
 0x4a1   : > { %s2130_s18 = scalar_lea.hbm %s2876_s14, 2048  ;;  %s2134_s30 = scalar_lea.hbm %s2948_s4, 8192 }
 0x4a2   : > { %p2131_p5 = scmp.ne.s32.totalorder %s2876_s14, %s2130_s18  ;;  %p2135_p8 = scmp.lt.u32.totalorder %s2876_s14, %s2948_s4 }
 0x4a3   : > { %p2136_p10 = scmp.lt.u32.totalorder %s2134_s30, %s2130_s18  ;;  %p2138_p13 = scmp.lt.u32.totalorder %s2130_s18, %s2876_s14 }
 0x4a4   : > { %p2132_p6 = pnand %p2131_p5, %p2363_p9 }
 0x4a5   : > { %p2137_p12 = por %p2136_p10, %p2135_p8 }
 0x4a6   : > { %p2133_p7 = pneg %p2132_p6 }
 0x4a7   : > { %p2139_p0 = por %p2138_p13, %p2137_p12 }
 0x4a9   : > { %p2140_p1 = pnand %p2139_p0, %p2133_p7 }
 0x4ab   : > { %2143 = shalt.err (!%p2140_p1)
}
 0x4ac   : > { %s2249_s23 = smov 128   ;;  %s2250_s25 = smov 256  }
 0x4ad   : > { %s2251_s19 = smov 8  }
 0x4ae   : > { %1906 = dma.vmem_to_hbm [thread:$0]  (%p2363_p9), %s2871_s28, 2048, %s2876_s14, %s2880_s12, %s2249_s23, %s2250_s25, %s2251_s19  }
 0x4af PF: > { %p1912_p2 = scmp.ge.s32.totalorder %s2242_s26, 2  ;;  %s1531_s20 = sand.u32 1, %s2198_s15  }
 0x4b0   : > { %s1532_s27 = scalar_lea.sflag [#allocation7], %s1531_s20 }
 0x4b1   : > { %p1909_p3 = pnand %p1912_p2, %p2370_p11 }
 0x4b3   : > { %2193 = dma.done.wait (!%p1909_p3), %s1532_s27, 2048  }
 0x4b4   : > { %2195 = vsyncadd (!%p1909_p3), %s1532_s27, 4294965248  ;;  %s17_s26 = sadd.s32 1, %s2242_s26   ;;  %s2972_s5 = sld [smem:[#allocation17_spill]] }
 0x4b5   : > { %p14_p4 = scmp.ge.s32.totalorder %s17_s26, 10   ;;  %s2973_s18 = sld [smem:[#allocation9_spill]] }
 0x4b6   : > { %s2974_s19 = sld [smem:[#allocation16_spill]]  ;;  %s2975_s20 = sld [smem:[#allocation10_spill]] }
 0x4b7   : > { %s2976_s21 = sld [smem:[#allocation11_spill]]  ;;  %s2977_s22 = sld [smem:[#allocation12_spill]] }
 0x4b8   : > { %s2978_s23 = sld [smem:[#allocation13_spill]]  ;;  %s2979_s24 = sld [smem:[#allocation14_spill]] }
 0x4b9   : > { %s2980_s25 = sld [smem:[#allocation15_spill]]  ;;  %s2981_s15 = smov %s2202_s16 }
 0x4ba   : > { %s2982_s16 = smov %s2206_s17  ;;  %s2983_s17 = smov %s2972_s5 }
 0x4bb   :  { %16 = sbr.rel (!%p14_p4) target bundleno = 9 (0x9), region = 131 }
 0x4c2   :  { %1537 = vsyncpa [#allocation7], 1 }
 0x4c3   :  { %1539 = vsyncpa [#allocation7 + $0x1], 1 }

</bundles_post_ra>
